<compile_context>
chip_gen: v6e
topology: v6e:2x2x1
jax: 0.10.0
libtpu: 0.0.40
codegen_flags: <defaults>
</compile_context>

<pallas_src>
import functools

import jax
import jax.numpy as jnp
from jax.experimental import pallas as pl
from jax.experimental.pallas import tpu as pltpu


# ------------------------------ tiling helpers --------------------------------

def _round_up(x, m):
    return ((x + m - 1) // m) * m


def _choose_tiles(num_nodes, d, num_rels, *, tm_target=512, tk_target=2048):
    """Pick (tm, tk, n_pad, d_pad).

    VMEM at the defaults (tm=512, tk=2048, d_pad=128):
      adj int8 tile 1 MiB x2 + dequant temps ~6 MiB + stk bf16 0.5 MiB x2 +
      acc/out/xdst/weights ~2 MiB  ->  ~12 MiB  (<< 32 MiB scoped default, v7x-safe).
    """
    n32 = _round_up(num_nodes, 32)                 # int8 rows want 32-sublane tiles
    tm = min(_round_up(tm_target, 32), n32)
    if n32 // tm < 2 and n32 >= 64:                # >=2 dst tiles -> megacore (v7x) split
        tm = max(32, _round_up(n32 // 2, 32))
    n_pad = _round_up(num_nodes, tm)
    k_total = num_rels * n_pad
    cap = max(128, min(_round_up(tk_target, 128), k_total))
    tk = k_total                                   # fallback: single K step (still legal)
    c = (cap // 128) * 128
    while c >= 128:
        if k_total % c == 0:
            tk = c
            break
        c -= 128
    d_pad = _round_up(d, 128)                      # lane-dense output stores
    return tm, tk, n_pad, d_pad


# ----------------------------- Pallas kernel ----------------------------------

def _rgcn_layer_kernel(*refs, apply_relu, fuse_next, num_rels):
    """One RelGraphConv layer for a (dst-tile, K-tile) grid point.

    inputs : adj (TM,TK) int8, scale (TM,1) f32, stk (TK,Dp) bf16, xdst (TM,Dp) f32,
             wloop (Dp,Dp) f32, bias (1,Dp) f32, [w_next (R,Dp,Dp) f32 if fused]
    outputs: o (TM,Dp), [stk_out (R,TM,Dp) bf16 if fused]
    scratch: acc (TM,Dp) f32
    """
    if fuse_next:
        (adj_ref, scale_ref, stk_ref, xdst_ref, wloop_ref, bias_ref, wnext_ref,
         o_ref, stk_out_ref, acc_ref) = refs
    else:
        (adj_ref, scale_ref, stk_ref, xdst_ref, wloop_ref, bias_ref,
         o_ref, acc_ref) = refs
        wnext_ref = stk_out_ref = None

    kk = pl.program_id(1)

    @pl.when(kk == 0)
    def _init():
        acc_ref[...] = jnp.zeros_like(acc_ref)

    # int8 quantized adjacency -> bf16 (0..127 exact in bf16); bf16 MXU matmul,
    # f32 accumulation.  Per-row dequant scale is folded in once at finalize.
    adj = adj_ref[...].astype(jnp.float32).astype(jnp.bfloat16)
    acc_ref[...] += jnp.dot(adj, stk_ref[...], preferred_element_type=jnp.float32)

    @pl.when(kk == pl.num_programs(1) - 1)
    def _finalize():
        h = acc_ref[...] * scale_ref[...]                     # dequantized messages
        h = h + jnp.dot(xdst_ref[...], wloop_ref[...],        # self-loop term (f32)
                        preferred_element_type=jnp.float32)
        h = h + bias_ref[...]
        if apply_relu:
            h = jnp.maximum(h, 0.0)                           # fused F.relu
        o_ref[...] = h.astype(o_ref.dtype)
        if fuse_next:
            # Fused epilogue: next layer's stacked operand stk2[r, v, :] = h[v] @ W2[r],
            # computed from the full-precision f32 tile (no extra HBM round trip).
            for r in range(num_rels):
                stk_out_ref[r] = jnp.dot(
                    h, wnext_ref[r], preferred_element_type=jnp.float32
                ).astype(stk_out_ref.dtype)


# ------------------------------ layer wrapper ----------------------------------

def _rgcn_layer(adj_q, adj_scale, stk, xdst, wloop, bias, *, apply_relu,
                out_dtype, tm, tk, w_next=None):
    n_pad, k_total = adj_q.shape
    d_pad = stk.shape[1]
    assert n_pad % tm == 0, "padded node count must be a multiple of tm"
    assert k_total % tk == 0, "folded contraction dim (R*n_pad) must be a multiple of tk"

    fuse = w_next is not None
    num_rels = w_next.shape[0] if fuse else 0

    in_specs = [
        # adjacency rows for this dst tile, K-tiled (streamed, bandwidth-critical);
        # if profiling shows exposed DMA, sweep pipeline_mode=pl.Buffered(3) here.
        pl.BlockSpec((tm, tk), lambda i, k: (i, k)),
        # per-dst-row int8 dequantization scale
        pl.BlockSpec((tm, 1), lambda i, k: (i, 0)),
        # stacked per-relation messages, K-tiled
        pl.BlockSpec((tk, d_pad), lambda i, k: (k, 0)),
        # destination-node features (self-loop term)
        pl.BlockSpec((tm, d_pad), lambda i, k: (i, 0)),
        # grid-invariant weights: single-buffered to reclaim VMEM for the adj stream
        pl.BlockSpec((d_pad, d_pad), lambda i, k: (0, 0), pipeline_mode=pl.Buffered(1)),
        pl.BlockSpec((1, d_pad), lambda i, k: (0, 0), pipeline_mode=pl.Buffered(1)),
    ]
    operands = [adj_q, adj_scale, stk, xdst, wloop, bias]

    if fuse:
        in_specs.append(pl.BlockSpec((num_rels, d_pad, d_pad), lambda i, k: (0, 0, 0),
                                     pipeline_mode=pl.Buffered(1)))
        operands.append(w_next)
        out_shape = (jax.ShapeDtypeStruct((n_pad, d_pad), out_dtype),
                     jax.ShapeDtypeStruct((num_rels, n_pad, d_pad), jnp.bfloat16))
        out_specs = (pl.BlockSpec((tm, d_pad), lambda i, k: (i, 0)),
                     pl.BlockSpec((num_rels, tm, d_pad), lambda i, k: (0, i, 0)))
    else:
        out_shape = jax.ShapeDtypeStruct((n_pad, d_pad), out_dtype)
        out_specs = pl.BlockSpec((tm, d_pad), lambda i, k: (i, 0))

    kernel = functools.partial(_rgcn_layer_kernel, apply_relu=apply_relu,
                               fuse_next=fuse, num_rels=num_rels)

    return pl.pallas_call(
        kernel,
        out_shape=out_shape,
        grid_spec=pltpu.PrefetchScalarGridSpec(
            num_scalar_prefetch=0,
            grid=(n_pad // tm, k_total // tk),           # (dst tiles, K tiles); K last
            in_specs=in_specs,
            out_specs=out_specs,
            scratch_shapes=[pltpu.VMEM((tm, d_pad), jnp.float32)],
        ),
        compiler_params=pltpu.CompilerParams(
            dimension_semantics=("parallel", "arbitrary"),   # megacore dst, reduce on K
            vmem_limit_bytes=48 * 1024 * 1024,               # headroom on v7x's 64 MiB
        ),
    )(*operands)


# ------------------------------ forward (jit) ----------------------------------

@functools.partial(jax.jit, static_argnames=("tm", "tk", "num_nodes", "out_dim"))
def rgcn_embed_forward(adj_q, adj_scale, emb_w, wdiag1, wloop1, b1, w2, wloop2, b2,
                       *, tm, tk, num_nodes, out_dim):
    """Full RGCNEmbed.forward (eval mode: dropout == identity).

    All operands are pre-padded / pre-quantized ONCE outside this per-call path
    (see prepare_adjacency / prepare_params).
    """
    n_pad, d_pad = emb_w.shape
    r = wdiag1.shape[0]

    # x = self.emb(self.node_ids) with node_ids == arange(num_nodes)
    x = emb_w

    # ---- layer 1 (BDD 1x1 blocks == per-relation diagonal) + fused ReLU ----
    # stk1[r*Np + u, :] = x[u, :] * wdiag1[r, :]     (tiny elementwise op vs adj traffic)
    stk1 = (wdiag1[:, None, :] * x[None, :, :]).reshape(r * n_pad, d_pad)
    stk1 = stk1.astype(jnp.bfloat16)
    h1, stk2_3d = _rgcn_layer(adj_q, adj_scale, stk1, x, wloop1, b1,
                              apply_relu=True, out_dtype=jnp.float32,
                              tm=tm, tk=tk, w_next=w2)
    # TODO(synk): dropout(p=0.2) between the layers is eval-mode identity here.

    # ---- layer 2 (full per-relation weights); stk2 came from the fused epilogue ----
    stk2 = stk2_3d.reshape(r * n_pad, d_pad)
    h2 = _rgcn_layer(adj_q, adj_scale, stk2, h1, wloop2, b2,
                     apply_relu=False, out_dtype=jnp.float32, tm=tm, tk=tk)
    return h2[:num_nodes, :out_dim]


# ---------------------- one-time host-side preparation -------------------------

def prepare_adjacency(src, dst, etype, norm, num_nodes, num_rels, n_pad):
    """Dense relation-folded adjacency adj[v, r*Np+u], quantized once to int8 with a
    per-destination-row scale (edge norms are >= 0).  Done OUTSIDE the per-call jit."""
    adj = jnp.zeros((n_pad, num_rels * n_pad), jnp.float32)
    adj = adj.at[dst, etype * n_pad + src].add(norm)
    rowmax = adj.max(axis=1, keepdims=True)
    scale = (rowmax / 127.0).astype(jnp.float32)                     # (Np, 1)
    q = jnp.where(rowmax > 0.0,
                  jnp.round(adj * (127.0 / jnp.maximum(rowmax, 1e-30))), 0.0)
    adj_q = jnp.clip(q, 0.0, 127.0).astype(jnp.int8)
    return adj_q, scale


def _pad2(x, rows, cols):
    return jnp.pad(x, ((0, rows - x.shape[0]), (0, cols - x.shape[1])))


def prepare_params(emb_w, wdiag1, wloop1, b1, w2, wloop2, b2, n_pad, d_pad):
    """Zero-pad parameters to the padded node / lane-dense feature dims (done once)."""
    r, d = wdiag1.shape
    emb_p    = _pad2(emb_w, n_pad, d_pad)
    wdiag1_p = _pad2(wdiag1, r, d_pad)
    wloop1_p = _pad2(wloop1, d_pad, d_pad)
    b1_p     = _pad2(b1.reshape(1, -1), 1, d_pad)
    w2_p     = jnp.pad(w2, ((0, 0), (0, d_pad - d), (0, d_pad - d)))
    wloop2_p = _pad2(wloop2, d_pad, d_pad)
    b2_p     = _pad2(b2.reshape(1, -1), 1, d_pad)
    return emb_p, wdiag1_p, wloop1_p, b1_p, w2_p, wloop2_p, b2_p


# ------------------------------ reference (JAX) ---------------------------------

def _ref_forward(adj3, emb_w, wdiag1, wloop1, b1, w2, wloop2, b2):
    x = emb_w
    m1 = jnp.einsum("rvu,ud->rvd", adj3, x)
    h1 = jnp.einsum("rvd,rd->vd", m1, wdiag1) + x @ wloop1 + b1
    x2 = jax.nn.relu(h1)
    m2 = jnp.einsum("rvu,ud->rvd", adj3, x2)
    h2 = jnp.einsum("rvd,rde->ve", m2, w2) + x2 @ wloop2 + b2
    return h2


# ---------------------------------- main ----------------------------------------

if __name__ == "__main__":
    num_nodes, d, num_rels, num_edges = 64, 32, 4, 256   # small synthetic graph

    key = jax.random.PRNGKey(0)
    keys = jax.random.split(key, 10)

    # deterministic "checkpoint": parameters per RGCNEmbed.__init__ shapes
    emb_w  = jax.random.normal(keys[0], (num_nodes, d), jnp.float32) * 0.1        # nn.Embedding
    wdiag1 = jax.random.normal(keys[1], (num_rels, d), jnp.float32) * 0.1         # rgc1 bdd (1x1 blocks)
    wloop1 = jax.random.normal(keys[2], (d, d), jnp.float32) * 0.1                # rgc1 self-loop
    b1     = (jax.random.normal(keys[3], (d,), jnp.float32) * 0.1).reshape(1, d)  # rgc1 bias
    w2     = jax.random.normal(keys[4], (num_rels, d, d), jnp.float32) * 0.1      # rgc2 per-relation
    wloop2 = jax.random.normal(keys[5], (d, d), jnp.float32) * 0.1                # rgc2 self-loop
    b2     = (jax.random.normal(keys[6], (d,), jnp.float32) * 0.1).reshape(1, d)  # rgc2 bias

    # deterministic synthetic graph: edge list (src, dst, etype, norm)
    src   = jax.random.randint(keys[7], (num_edges,), 0, num_nodes)
    dst   = jax.random.randint(keys[8], (num_edges,), 0, num_nodes)
    etype = jax.random.randint(keys[9], (num_edges,), 0, num_rels)
    in_deg = jnp.zeros((num_nodes,), jnp.float32).at[dst].add(1.0)
    norm = 1.0 / jnp.maximum(in_deg[dst], 1.0)     # DGL-style 1/in-degree edge norm

    # small tile targets so the toy graph exercises BOTH grid axes: grid = (2, 2)
    tm, tk, n_pad, d_pad = _choose_tiles(num_nodes, d, num_rels,
                                         tm_target=32, tk_target=128)

    # one-time preparation (outside the per-call jit): int8 adjacency + padded params
    adj_q, adj_scale = prepare_adjacency(src, dst, etype, norm,
                                         num_nodes, num_rels, n_pad)
    params = prepare_params(emb_w, wdiag1, wloop1, b1, w2, wloop2, b2, n_pad, d_pad)

    out = rgcn_embed_forward(adj_q, adj_scale, *params,
                             tm=tm, tk=tk, num_nodes=num_nodes, out_dim=d)
    out = jax.block_until_ready(out)

    # pure-JAX reference on the exact f32 adjacency
    adj3 = jnp.zeros((num_rels, num_nodes, num_nodes), jnp.float32)
    adj3 = adj3.at[etype, dst, src].add(norm)
    ref = _ref_forward(adj3, emb_w, wdiag1, wloop1, b1, w2, wloop2, b2)

    assert out.shape == (num_nodes, d) and out.dtype == jnp.float32
    # int8 adjacency + bf16 message operands with f32 accumulation -> loosened tolerance
    assert jnp.allclose(out, ref, atol=2e-2, rtol=2e-2), "mismatch vs JAX reference"

    print("KERNEL_OK")
</pallas_src>

<mosaic_0001>
module attributes {stable_mosaic.version = 11 : i64} {
  func.func @_rgcn_layer_kernel(%arg0: i32, %arg1: i32, %arg2: memref<32x128xi8, #tpu.memory_space<vmem>>, %arg3: memref<32x1xf32, #tpu.memory_space<vmem>>, %arg4: memref<128x128xbf16, #tpu.memory_space<vmem>>, %arg5: memref<32x128xf32, #tpu.memory_space<vmem>>, %arg6: memref<128x128xf32, #tpu.memory_space<vmem>>, %arg7: memref<1x128xf32, #tpu.memory_space<vmem>>, %arg8: memref<32x128xf32, #tpu.memory_space<vmem>>, %arg9: memref<32x128xf32, #tpu.memory_space<vmem>>) attributes {dimension_semantics = [#tpu.dimension_semantics<parallel>, #tpu.dimension_semantics<arbitrary>], iteration_bounds = array<i64: 2, 2>, scalar_prefetch = 0 : i64, scratch_operands = 1 : i64, tpu.core_type = #tpu.core_type<tc>, window_params = [{transform_indices = @transform_0, window_bounds = array<i64: 32, 128>}, {transform_indices = @transform_1, window_bounds = array<i64: 32, 1>}, {transform_indices = @transform_2, window_bounds = array<i64: 128, 128>}, {transform_indices = @transform_3, window_bounds = array<i64: 32, 128>}, {pipeline_mode = #tpu.pipeline_mode<synchronous>, transform_indices = @transform_4, window_bounds = array<i64: 128, 128>}, {pipeline_mode = #tpu.pipeline_mode<synchronous>, transform_indices = @transform_5, window_bounds = array<i64: 1, 128>}, {transform_indices = @transform_6, window_bounds = array<i64: 32, 128>}]} {
    %c0_i32 = arith.constant 0 : i32
    %0 = arith.cmpi eq, %arg1, %c0_i32 : i32
    %1 = arith.extui %0 : i1 to i32
    %c0_i32_0 = arith.constant 0 : i32
    %2 = arith.cmpi ne, %1, %c0_i32_0 : i32
    scf.if %2 {
      %cst_9 = arith.constant 0.000000e+00 : f32
      %14 = vector.broadcast %cst_9 : f32 to vector<32x128xf32>
      %c0_10 = arith.constant 0 : index
      %c0_11 = arith.constant 0 : index
      %15 = vector.load %arg9[%c0_10, %c0_11] : memref<32x128xf32, #tpu.memory_space<vmem>>, vector<32x128xf32>
      tpu.vector_store %arg9[%c0_10, %c0_11], %14 {strides = array<i32>} : memref<32x128xf32, #tpu.memory_space<vmem>>, vector<32x128xf32>,
    } else {
    }
    %c0 = arith.constant 0 : index
    %c0_1 = arith.constant 0 : index
    %3 = vector.load %arg2[%c0, %c0_1] : memref<32x128xi8, #tpu.memory_space<vmem>>, vector<32x128xi8>
    %4 = arith.sitofp %3 : vector<32x128xi8> to vector<32x128xf32>
    %5 = arith.truncf %4 : vector<32x128xf32> to vector<32x128xbf16>
    %c0_2 = arith.constant 0 : index
    %c0_3 = arith.constant 0 : index
    %6 = vector.load %arg9[%c0_2, %c0_3] : memref<32x128xf32, #tpu.memory_space<vmem>>, vector<32x128xf32>
    %c0_4 = arith.constant 0 : index
    %c0_5 = arith.constant 0 : index
    %7 = vector.load %arg4[%c0_4, %c0_5] : memref<128x128xbf16, #tpu.memory_space<vmem>>, vector<128x128xbf16>
    %cst = arith.constant dense<0.000000e+00> : vector<32x128xf32>
    %8 = tpu.matmul %5, %7, %cst {dimension_numbers = #tpu.dot_dimension_numbers<[1], [0], [0], [1], [0, 0, 1, 1], [], []>} : vector<32x128xbf16>, vector<128x128xbf16>, vector<32x128xf32> -> vector<32x128xf32>
    %9 = arith.addf %6, %8 : vector<32x128xf32>
    %c0_6 = arith.constant 0 : index
    %c0_7 = arith.constant 0 : index
    %10 = vector.load %arg9[%c0_6, %c0_7] : memref<32x128xf32, #tpu.memory_space<vmem>>, vector<32x128xf32>
    tpu.vector_store %arg9[%c0_6, %c0_7], %9 {strides = array<i32>} : memref<32x128xf32, #tpu.memory_space<vmem>>, vector<32x128xf32>,
    %c1_i32 = arith.constant 1 : i32
    %11 = arith.cmpi eq, %arg1, %c1_i32 : i32
    %12 = arith.extui %11 : i1 to i32
    %c0_i32_8 = arith.constant 0 : i32
    %13 = arith.cmpi ne, %12, %c0_i32_8 : i32
    scf.if %13 {
      %c0_9 = arith.constant 0 : index
      %c0_10 = arith.constant 0 : index
      %14 = vector.load %arg9[%c0_9, %c0_10] : memref<32x128xf32, #tpu.memory_space<vmem>>, vector<32x128xf32>
      %c0_11 = arith.constant 0 : index
      %c0_12 = arith.constant 0 : index
      %15 = vector.load %arg3[%c0_11, %c0_12] : memref<32x1xf32, #tpu.memory_space<vmem>>, vector<32x1xf32>
      %16 = vector.broadcast %15 : vector<32x1xf32> to vector<32x128xf32>
      %17 = arith.mulf %14, %16 : vector<32x128xf32>
      %c0_13 = arith.constant 0 : index
      %c0_14 = arith.constant 0 : index
      %18 = vector.load %arg5[%c0_13, %c0_14] : memref<32x128xf32, #tpu.memory_space<vmem>>, vector<32x128xf32>
      %c0_15 = arith.constant 0 : index
      %c0_16 = arith.constant 0 : index
      %19 = vector.load %arg6[%c0_15, %c0_16] : memref<128x128xf32, #tpu.memory_space<vmem>>, vector<128x128xf32>
      %cst_17 = arith.constant dense<0.000000e+00> : vector<32x128xf32>
      %20 = tpu.matmul %18, %19, %cst_17 {dimension_numbers = #tpu.dot_dimension_numbers<[1], [0], [0], [1], [0, 0, 1, 1], [], []>} : vector<32x128xf32>, vector<128x128xf32>, vector<32x128xf32> -> vector<32x128xf32>
      %21 = arith.addf %17, %20 : vector<32x128xf32>
      %c0_18 = arith.constant 0 : index
      %c0_19 = arith.constant 0 : index
      %22 = vector.load %arg7[%c0_18, %c0_19] : memref<1x128xf32, #tpu.memory_space<vmem>>, vector<1x128xf32>
      %23 = vector.broadcast %22 : vector<1x128xf32> to vector<32x128xf32>
      %24 = arith.addf %21, %23 : vector<32x128xf32>
      %c0_20 = arith.constant 0 : index
      %c0_21 = arith.constant 0 : index
      %25 = vector.load %arg8[%c0_20, %c0_21] : memref<32x128xf32, #tpu.memory_space<vmem>>, vector<32x128xf32>
      tpu.vector_store %arg8[%c0_20, %c0_21], %24 {strides = array<i32>} : memref<32x128xf32, #tpu.memory_space<vmem>>, vector<32x128xf32>,
    } else {
    }
    return
  }
  func.func @transform_0(%arg0: i32, %arg1: i32) -> (i32, i32) {
    %c0_i32 = arith.constant 0 : i32
    return %arg0, %arg1 : i32, i32
  }
  func.func @transform_1(%arg0: i32, %arg1: i32) -> (i32, i32) {
    %c0_i32 = arith.constant 0 : i32
    %c0_i32_0 = arith.constant 0 : i32
    return %arg0, %c0_i32 : i32, i32
  }
  func.func @transform_2(%arg0: i32, %arg1: i32) -> (i32, i32) {
    %c0_i32 = arith.constant 0 : i32
    %c0_i32_0 = arith.constant 0 : i32
    return %arg1, %c0_i32 : i32, i32
  }
  func.func @transform_3(%arg0: i32, %arg1: i32) -> (i32, i32) {
    %c0_i32 = arith.constant 0 : i32
    %c0_i32_0 = arith.constant 0 : i32
    return %arg0, %c0_i32 : i32, i32
  }
  func.func @transform_4(%arg0: i32, %arg1: i32) -> (i32, i32) {
    %c0_i32 = arith.constant 0 : i32
    %c0_i32_0 = arith.constant 0 : i32
    %c0_i32_1 = arith.constant 0 : i32
    return %c0_i32, %c0_i32_0 : i32, i32
  }
  func.func @transform_5(%arg0: i32, %arg1: i32) -> (i32, i32) {
    %c0_i32 = arith.constant 0 : i32
    %c0_i32_0 = arith.constant 0 : i32
    %c0_i32_1 = arith.constant 0 : i32
    return %c0_i32, %c0_i32_0 : i32, i32
  }
  func.func @transform_6(%arg0: i32, %arg1: i32) -> (i32, i32) {
    %c0_i32 = arith.constant 0 : i32
    %c0_i32_0 = arith.constant 0 : i32
    return %arg0, %c0_i32 : i32, i32
  }
}

module attributes {stable_mosaic.version = 11 : i64} {
  func.func @_rgcn_layer_kernel(%arg0: i32, %arg1: i32, %arg2: memref<32x128xi8, #tpu.memory_space<vmem>>, %arg3: memref<32x1xf32, #tpu.memory_space<vmem>>, %arg4: memref<128x128xbf16, #tpu.memory_space<vmem>>, %arg5: memref<32x128xf32, #tpu.memory_space<vmem>>, %arg6: memref<128x128xf32, #tpu.memory_space<vmem>>, %arg7: memref<1x128xf32, #tpu.memory_space<vmem>>, %arg8: memref<4x128x128xf32, #tpu.memory_space<vmem>>, %arg9: memref<32x128xf32, #tpu.memory_space<vmem>>, %arg10: memref<4x32x128xbf16, #tpu.memory_space<vmem>>, %arg11: memref<32x128xf32, #tpu.memory_space<vmem>>) attributes {dimension_semantics = [#tpu.dimension_semantics<parallel>, #tpu.dimension_semantics<arbitrary>], iteration_bounds = array<i64: 2, 2>, scalar_prefetch = 0 : i64, scratch_operands = 1 : i64, tpu.core_type = #tpu.core_type<tc>, window_params = [{transform_indices = @transform_0, window_bounds = array<i64: 32, 128>}, {transform_indices = @transform_1, window_bounds = array<i64: 32, 1>}, {transform_indices = @transform_2, window_bounds = array<i64: 128, 128>}, {transform_indices = @transform_3, window_bounds = array<i64: 32, 128>}, {pipeline_mode = #tpu.pipeline_mode<synchronous>, transform_indices = @transform_4, window_bounds = array<i64: 128, 128>}, {pipeline_mode = #tpu.pipeline_mode<synchronous>, transform_indices = @transform_5, window_bounds = array<i64: 1, 128>}, {pipeline_mode = #tpu.pipeline_mode<synchronous>, transform_indices = @transform_6, window_bounds = array<i64: 4, 128, 128>}, {transform_indices = @transform_7, window_bounds = array<i64: 32, 128>}, {transform_indices = @transform_8, window_bounds = array<i64: 4, 32, 128>}]} {
    %c0_i32 = arith.constant 0 : i32
    %0 = arith.cmpi eq, %arg1, %c0_i32 : i32
    %1 = arith.extui %0 : i1 to i32
    %c0_i32_0 = arith.constant 0 : i32
    %2 = arith.cmpi ne, %1, %c0_i32_0 : i32
    scf.if %2 {
      %cst_9 = arith.constant 0.000000e+00 : f32
      %14 = vector.broadcast %cst_9 : f32 to vector<32x128xf32>
      %c0_10 = arith.constant 0 : index
      %c0_11 = arith.constant 0 : index
      %15 = vector.load %arg11[%c0_10, %c0_11] : memref<32x128xf32, #tpu.memory_space<vmem>>, vector<32x128xf32>
      tpu.vector_store %arg11[%c0_10, %c0_11], %14 {strides = array<i32>} : memref<32x128xf32, #tpu.memory_space<vmem>>, vector<32x128xf32>,
    } else {
    }
    %c0 = arith.constant 0 : index
    %c0_1 = arith.constant 0 : index
    %3 = vector.load %arg2[%c0, %c0_1] : memref<32x128xi8, #tpu.memory_space<vmem>>, vector<32x128xi8>
    %4 = arith.sitofp %3 : vector<32x128xi8> to vector<32x128xf32>
    %5 = arith.truncf %4 : vector<32x128xf32> to vector<32x128xbf16>
    %c0_2 = arith.constant 0 : index
    %c0_3 = arith.constant 0 : index
    %6 = vector.load %arg11[%c0_2, %c0_3] : memref<32x128xf32, #tpu.memory_space<vmem>>, vector<32x128xf32>
    %c0_4 = arith.constant 0 : index
    %c0_5 = arith.constant 0 : index
    %7 = vector.load %arg4[%c0_4, %c0_5] : memref<128x128xbf16, #tpu.memory_space<vmem>>, vector<128x128xbf16>
    %cst = arith.constant dense<0.000000e+00> : vector<32x128xf32>
    %8 = tpu.matmul %5, %7, %cst {dimension_numbers = #tpu.dot_dimension_numbers<[1], [0], [0], [1], [0, 0, 1, 1], [], []>} : vector<32x128xbf16>, vector<128x128xbf16>, vector<32x128xf32> -> vector<32x128xf32>
    %9 = arith.addf %6, %8 : vector<32x128xf32>
    %c0_6 = arith.constant 0 : index
    %c0_7 = arith.constant 0 : index
    %10 = vector.load %arg11[%c0_6, %c0_7] : memref<32x128xf32, #tpu.memory_space<vmem>>, vector<32x128xf32>
    tpu.vector_store %arg11[%c0_6, %c0_7], %9 {strides = array<i32>} : memref<32x128xf32, #tpu.memory_space<vmem>>, vector<32x128xf32>,
    %c1_i32 = arith.constant 1 : i32
    %11 = arith.cmpi eq, %arg1, %c1_i32 : i32
    %12 = arith.extui %11 : i1 to i32
    %c0_i32_8 = arith.constant 0 : i32
    %13 = arith.cmpi ne, %12, %c0_i32_8 : i32
    scf.if %13 {
      %c0_9 = arith.constant 0 : index
      %c0_10 = arith.constant 0 : index
      %14 = vector.load %arg11[%c0_9, %c0_10] : memref<32x128xf32, #tpu.memory_space<vmem>>, vector<32x128xf32>
      %c0_11 = arith.constant 0 : index
      %c0_12 = arith.constant 0 : index
      %15 = vector.load %arg3[%c0_11, %c0_12] : memref<32x1xf32, #tpu.memory_space<vmem>>, vector<32x1xf32>
      %16 = vector.broadcast %15 : vector<32x1xf32> to vector<32x128xf32>
      %17 = arith.mulf %14, %16 : vector<32x128xf32>
      %c0_13 = arith.constant 0 : index
      %c0_14 = arith.constant 0 : index
      %18 = vector.load %arg5[%c0_13, %c0_14] : memref<32x128xf32, #tpu.memory_space<vmem>>, vector<32x128xf32>
      %c0_15 = arith.constant 0 : index
      %c0_16 = arith.constant 0 : index
      %19 = vector.load %arg6[%c0_15, %c0_16] : memref<128x128xf32, #tpu.memory_space<vmem>>, vector<128x128xf32>
      %cst_17 = arith.constant dense<0.000000e+00> : vector<32x128xf32>
      %20 = tpu.matmul %18, %19, %cst_17 {dimension_numbers = #tpu.dot_dimension_numbers<[1], [0], [0], [1], [0, 0, 1, 1], [], []>} : vector<32x128xf32>, vector<128x128xf32>, vector<32x128xf32> -> vector<32x128xf32>
      %21 = arith.addf %17, %20 : vector<32x128xf32>
      %c0_18 = arith.constant 0 : index
      %c0_19 = arith.constant 0 : index
      %22 = vector.load %arg7[%c0_18, %c0_19] : memref<1x128xf32, #tpu.memory_space<vmem>>, vector<1x128xf32>
      %23 = vector.broadcast %22 : vector<1x128xf32> to vector<32x128xf32>
      %24 = arith.addf %21, %23 : vector<32x128xf32>
      %cst_20 = arith.constant 0.000000e+00 : f32
      %25 = vector.broadcast %cst_20 : f32 to vector<32x128xf32>
      %26 = arith.maximumf %24, %25 : vector<32x128xf32>
      %c0_21 = arith.constant 0 : index
      %c0_22 = arith.constant 0 : index
      %27 = vector.load %arg9[%c0_21, %c0_22] : memref<32x128xf32, #tpu.memory_space<vmem>>, vector<32x128xf32>
      tpu.vector_store %arg9[%c0_21, %c0_22], %26 {strides = array<i32>} : memref<32x128xf32, #tpu.memory_space<vmem>>, vector<32x128xf32>,
      %c0_23 = arith.constant 0 : index
      %c0_24 = arith.constant 0 : index
      %c0_25 = arith.constant 0 : index
      %28 = vector.load %arg8[%c0_23, %c0_24, %c0_25] : memref<4x128x128xf32, #tpu.memory_space<vmem>>, vector<1x128x128xf32>
      %29 = vector.shape_cast %28 : vector<1x128x128xf32> to vector<128x128xf32>
      %cst_26 = arith.constant dense<0.000000e+00> : vector<32x128xf32>
      %30 = tpu.matmul %26, %29, %cst_26 {dimension_numbers = #tpu.dot_dimension_numbers<[1], [0], [0], [1], [0, 0, 1, 1], [], []>} : vector<32x128xf32>, vector<128x128xf32>, vector<32x128xf32> -> vector<32x128xf32>
      %31 = arith.truncf %30 : vector<32x128xf32> to vector<32x128xbf16>
      %c0_27 = arith.constant 0 : index
      %c0_28 = arith.constant 0 : index
      %c0_29 = arith.constant 0 : index
      %32 = vector.load %arg10[%c0_27, %c0_28, %c0_29] : memref<4x32x128xbf16, #tpu.memory_space<vmem>>, vector<1x32x128xbf16>
      %33 = vector.shape_cast %32 : vector<1x32x128xbf16> to vector<32x128xbf16>
      %34 = vector.shape_cast %31 : vector<32x128xbf16> to vector<1x32x128xbf16>
      tpu.vector_store %arg10[%c0_27, %c0_28, %c0_29], %34 {strides = array<i32>} : memref<4x32x128xbf16, #tpu.memory_space<vmem>>, vector<1x32x128xbf16>,
      %c1 = arith.constant 1 : index
      %c0_30 = arith.constant 0 : index
      %c0_31 = arith.constant 0 : index
      %35 = vector.load %arg8[%c1, %c0_30, %c0_31] : memref<4x128x128xf32, #tpu.memory_space<vmem>>, vector<1x128x128xf32>
      %36 = vector.shape_cast %35 : vector<1x128x128xf32> to vector<128x128xf32>
      %cst_32 = arith.constant dense<0.000000e+00> : vector<32x128xf32>
      %37 = tpu.matmul %26, %36, %cst_32 {dimension_numbers = #tpu.dot_dimension_numbers<[1], [0], [0], [1], [0, 0, 1, 1], [], []>} : vector<32x128xf32>, vector<128x128xf32>, vector<32x128xf32> -> vector<32x128xf32>
      %38 = arith.truncf %37 : vector<32x128xf32> to vector<32x128xbf16>
      %c1_33 = arith.constant 1 : index
      %c0_34 = arith.constant 0 : index
      %c0_35 = arith.constant 0 : index
      %39 = vector.load %arg10[%c1_33, %c0_34, %c0_35] : memref<4x32x128xbf16, #tpu.memory_space<vmem>>, vector<1x32x128xbf16>
      %40 = vector.shape_cast %39 : vector<1x32x128xbf16> to vector<32x128xbf16>
      %41 = vector.shape_cast %38 : vector<32x128xbf16> to vector<1x32x128xbf16>
      tpu.vector_store %arg10[%c1_33, %c0_34, %c0_35], %41 {strides = array<i32>} : memref<4x32x128xbf16, #tpu.memory_space<vmem>>, vector<1x32x128xbf16>,
      %c2 = arith.constant 2 : index
      %c0_36 = arith.constant 0 : index
      %c0_37 = arith.constant 0 : index
      %42 = vector.load %arg8[%c2, %c0_36, %c0_37] : memref<4x128x128xf32, #tpu.memory_space<vmem>>, vector<1x128x128xf32>
      %43 = vector.shape_cast %42 : vector<1x128x128xf32> to vector<128x128xf32>
      %cst_38 = arith.constant dense<0.000000e+00> : vector<32x128xf32>
      %44 = tpu.matmul %26, %43, %cst_38 {dimension_numbers = #tpu.dot_dimension_numbers<[1], [0], [0], [1], [0, 0, 1, 1], [], []>} : vector<32x128xf32>, vector<128x128xf32>, vector<32x128xf32> -> vector<32x128xf32>
      %45 = arith.truncf %44 : vector<32x128xf32> to vector<32x128xbf16>
      %c2_39 = arith.constant 2 : index
      %c0_40 = arith.constant 0 : index
      %c0_41 = arith.constant 0 : index
      %46 = vector.load %arg10[%c2_39, %c0_40, %c0_41] : memref<4x32x128xbf16, #tpu.memory_space<vmem>>, vector<1x32x128xbf16>
      %47 = vector.shape_cast %46 : vector<1x32x128xbf16> to vector<32x128xbf16>
      %48 = vector.shape_cast %45 : vector<32x128xbf16> to vector<1x32x128xbf16>
      tpu.vector_store %arg10[%c2_39, %c0_40, %c0_41], %48 {strides = array<i32>} : memref<4x32x128xbf16, #tpu.memory_space<vmem>>, vector<1x32x128xbf16>,
      %c3 = arith.constant 3 : index
      %c0_42 = arith.constant 0 : index
      %c0_43 = arith.constant 0 : index
      %49 = vector.load %arg8[%c3, %c0_42, %c0_43] : memref<4x128x128xf32, #tpu.memory_space<vmem>>, vector<1x128x128xf32>
      %50 = vector.shape_cast %49 : vector<1x128x128xf32> to vector<128x128xf32>
      %cst_44 = arith.constant dense<0.000000e+00> : vector<32x128xf32>
      %51 = tpu.matmul %26, %50, %cst_44 {dimension_numbers = #tpu.dot_dimension_numbers<[1], [0], [0], [1], [0, 0, 1, 1], [], []>} : vector<32x128xf32>, vector<128x128xf32>, vector<32x128xf32> -> vector<32x128xf32>
      %52 = arith.truncf %51 : vector<32x128xf32> to vector<32x128xbf16>
      %c3_45 = arith.constant 3 : index
      %c0_46 = arith.constant 0 : index
      %c0_47 = arith.constant 0 : index
      %53 = vector.load %arg10[%c3_45, %c0_46, %c0_47] : memref<4x32x128xbf16, #tpu.memory_space<vmem>>, vector<1x32x128xbf16>
      %54 = vector.shape_cast %53 : vector<1x32x128xbf16> to vector<32x128xbf16>
      %55 = vector.shape_cast %52 : vector<32x128xbf16> to vector<1x32x128xbf16>
      tpu.vector_store %arg10[%c3_45, %c0_46, %c0_47], %55 {strides = array<i32>} : memref<4x32x128xbf16, #tpu.memory_space<vmem>>, vector<1x32x128xbf16>,
    } else {
    }
    return
  }
  func.func @transform_0(%arg0: i32, %arg1: i32) -> (i32, i32) {
    %c0_i32 = arith.constant 0 : i32
    return %arg0, %arg1 : i32, i32
  }
  func.func @transform_1(%arg0: i32, %arg1: i32) -> (i32, i32) {
    %c0_i32 = arith.constant 0 : i32
    %c0_i32_0 = arith.constant 0 : i32
    return %arg0, %c0_i32 : i32, i32
  }
  func.func @transform_2(%arg0: i32, %arg1: i32) -> (i32, i32) {
    %c0_i32 = arith.constant 0 : i32
    %c0_i32_0 = arith.constant 0 : i32
    return %arg1, %c0_i32 : i32, i32
  }
  func.func @transform_3(%arg0: i32, %arg1: i32) -> (i32, i32) {
    %c0_i32 = arith.constant 0 : i32
    %c0_i32_0 = arith.constant 0 : i32
    return %arg0, %c0_i32 : i32, i32
  }
  func.func @transform_4(%arg0: i32, %arg1: i32) -> (i32, i32) {
    %c0_i32 = arith.constant 0 : i32
    %c0_i32_0 = arith.constant 0 : i32
    %c0_i32_1 = arith.constant 0 : i32
    return %c0_i32, %c0_i32_0 : i32, i32
  }
  func.func @transform_5(%arg0: i32, %arg1: i32) -> (i32, i32) {
    %c0_i32 = arith.constant 0 : i32
    %c0_i32_0 = arith.constant 0 : i32
    %c0_i32_1 = arith.constant 0 : i32
    return %c0_i32, %c0_i32_0 : i32, i32
  }
  func.func @transform_6(%arg0: i32, %arg1: i32) -> (i32, i32, i32) {
    %c0_i32 = arith.constant 0 : i32
    %c0_i32_0 = arith.constant 0 : i32
    %c0_i32_1 = arith.constant 0 : i32
    %c0_i32_2 = arith.constant 0 : i32
    return %c0_i32, %c0_i32_0, %c0_i32_1 : i32, i32, i32
  }
  func.func @transform_7(%arg0: i32, %arg1: i32) -> (i32, i32) {
    %c0_i32 = arith.constant 0 : i32
    %c0_i32_0 = arith.constant 0 : i32
    return %arg0, %c0_i32 : i32, i32
  }
  func.func @transform_8(%arg0: i32, %arg1: i32) -> (i32, i32, i32) {
    %c0_i32 = arith.constant 0 : i32
    %c0_i32_0 = arith.constant 0 : i32
    %c0_i32_1 = arith.constant 0 : i32
    return %c0_i32, %arg0, %c0_i32_0 : i32, i32, i32
  }
}

</mosaic_0001>

<bundles_post_ra>
// kernel: rgcn_embed_forward.3
= control target key start
LH: loop header
LB: loop body
LE: loop exit
PB: predicated region body
PF: predicated region fallthrough
CT: control target
= control target key end

     0   :  { %s1026_s21 = smov 0   ;;  %s1028_s22 = smov 0   ;;  %s1172_s0 = inlined_call_operand.vmem [shape: s8[64,256], index: 0, kind: input, shape index: {}]   ;;  %s1173_s1 = inlined_call_operand.vmem [shape: f32[64,1], index: 1, kind: input, shape index: {}]   ;;  %s1174_s2 = inlined_call_operand.vmem [shape: bf16[256,128], index: 2, kind: input, shape index: {}]   ;;  %s1175_s3 = inlined_call_operand.vmem [shape: f32[64,128], index: 3, kind: input, shape index: {}]   ;;  %s1176_s4 = inlined_call_operand.vmem [shape: f32[128,128], index: 4, kind: input, shape index: {}]   ;;  %s1177_s5 = inlined_call_operand.vmem [shape: f32[1,128], index: 5, kind: input, shape index: {}]   ;;  %s1178_s6 = inlined_call_operand.vmem [shape: f32[64,128], index: 6, kind: output, shape index: {}]  }
   0x1   :  { %s1030_s23 = smov 0   ;;  %s1032_s24 = smov 0  }
   0x2   :  { %s1034_s25 = smov 0  }
   0x3 LB: > { %s25_s26 = sadd.s32 1, %s979_s23  ;;  %s28_s27 = sadd.s32 1, %s983_s24  ;;  %s987_s25 = sphi %s1034_s25, %s16_s25   ;;  %s983_s24 = sphi %s1032_s24, %s1182_s24   ;;  %s979_s23 = sphi %s1030_s23, %s1181_s23   ;;  %s975_s22 = sphi %s1028_s22, %s1180_s22   ;;  %s971_s21 = sphi %s1026_s21, %s1179_s21  }
   0x4   : > { %p26_p0 = scmp.ge.s32.totalorder %s25_s26, 2  ;;  %p753_p1 = scmp.ge.s32.totalorder %s987_s25, 1 }
   0x5   : > { %p262_p2 = scmp.lt.s32.totalorder %s987_s25, 5 }
   0x6   : > { %s1184_s26 = smov (%p26_p0, %s25_s26), 0  ;;  %s1186_s27 = smov (!%p26_p0, %s28_s27), %s983_s24 }
   0x7   : > { %p263_p3 = pnand %p753_p1, %p262_p2  ;;  %p30_p4 = scmp.ge.s32.totalorder %s1186_s27, 2 }
   0x8   : > { %p310_p5 = scmp.lt.s32.totalorder (!%p263_p3), %s975_s22, 1  ;;  %p312_p6 = scmp.lt.s32.totalorder (!%p263_p3), %s971_s21, 1 }
   0x9   : > { %s1188_s27 = smov (%p30_p4, %s1186_s27), 0  ;;  %266 = sbr.rel (%p263_p3) target bundleno = 498 (0x1f2), region = 44 }
   0xa   : > { %s756_s28 = sshll.u32 (!%p263_p3), %s975_s22, 2  ;;  %s758_s29 = sshll.u32 (!%p263_p3), %s971_s21, 4 }
   0xb   : > { %p319_p7 = scmp.lt.s32.totalorder (!%p263_p3), %s756_s28, 7  ;;  %p325_p8 = scmp.lt.s32.totalorder (!%p263_p3), %s758_s29, 31 }
   0xc   : > { %p764_p9 = scmp.ne.s32.totalorder (!%p263_p3), %s971_s21, 0 }
   0xe   : > { %s1190_s22 = smov (!%p310_p5, %s975_s22), 1  ;;  %s1192_s28 = smov (!%p319_p7, %s756_s28), 7 }
   0xf   : > { %s313_s30 = scalar_select %p312_p6, %s971_s21, 1 }
  0x10   : > { %s754_s7 = sshll.u32 %s1190_s22, 1  ;;  %s1194_s29 = smov (!%p325_p8, %s758_s29), 31 }
  0x11   : > { %s315_s8 = sadd.s32 %s754_s7, %s313_s30  ;;  %s757_s13 = sshll.u32 %s1192_s28, 3 }
  0x12   : > { %s755_s9 = sshll.u32 %s315_s8, 3  ;;  %s1067_s16 = scalar_lea.vmem %s1173_s1, %s757_s13 }
  0x13   : > { %s317_s12 = scalar_lea.vmem %s1172_s0, %s755_s9  ;;  %s759_s17 = sshll.u32 %s1194_s29, 2 }
  0x14   : > { %s1072_s20 = scalar_lea.vmem %s1174_s2, %s759_s17  ;;  %s1077_s7 = scalar_lea.vmem %s1175_s3, %s757_s13 }
  0x15   : > { %s1082_s28 = scalar_lea.vmem %s1178_s6, %s757_s13  ;;  %346 = sbr.rel (%p764_p9) target bundleno = 29 (0x1d), region = 48 }
  0x1a   : > { %v989_v0 = vmov 0.0  }
  0x1b   : > { %347 = vst [vmem:[#allocation2 + $0x10] sm:$0xff] %v989_v0  ;;  %348 = vst [vmem:[#allocation2] sm:$0xff] %v989_v0 }
  0x1c   : > { %349 = vst [vmem:[#allocation2 + $0x18] sm:$0xff] %v989_v0  ;;  %350 = vst [vmem:[#allocation2 + $0x8] sm:$0xff] %v989_v0 }
  0x1d PF: > { %v939_v1 = vld [vmem:[%s1072_s20 + $0x38] sm:$0xff]   ;;  %v940_v2 = vld [vmem:[%s1072_s20 + $0x30] sm:$0xff]   ;;  %v941_v3 = vld [vmem:[%s1072_s20 + $0x28] sm:$0xff]   ;;  %p773_p10 = scmp.ne.s32.totalorder %s971_s21, 1 }
  0x1e   : > { %807 = vmatprep.subr.bf16.mxu0 %v939_v1  ;;  %v942_v4 = vld [vmem:[%s1072_s20 + $0x20] sm:$0xff]   ;;  %v943_v7 = vld [vmem:[%s1072_s20 + $0x18] sm:$0xff]   ;;  %v944_v8 = vld [vmem:[%s1072_s20 + $0x10] sm:$0xff]  }
  0x1f   : > { %808 = vmatpush3.bf16.msra.mxu0 %v939_v1  ;;  %v351_v5 = vld [vmem:[%s317_s12] sm:$0xff]  ;;  %v945_v9 = vld [vmem:[%s1072_s20 + $0x8] sm:$0xff]  }
  0x20   : > { %809 = vmatprep.subr.bf16.mxu0 %v940_v2  ;;  %v352_v6 = vunpack.c.l.s8.bf16 %v351_v5  ;;  %v946_v10 = vld [vmem:[%s1072_s20] sm:$0xff]   ;;  %v353_v11 = vunpack.c.h.s8.bf16 %v351_v5 }
  0x22   : > { %823 = vmatprep.mubr.bf16.mxu0 %v352_v6  ;;  %v354_v14 = vld [vmem:[#allocation2 + $0x10] sm:$0xff]  ;;  %v355_v20 = vld [vmem:[#allocation2] sm:$0xff] }
  0x23   : > { %810 = vmatpush3.bf16.msra.mxu0 %v940_v2  ;;  %v356_v12 = vld [vmem:[#allocation2 + $0x18] sm:$0xff]  ;;  %v357_v17 = vld [vmem:[#allocation2 + $0x8] sm:$0xff] }
  0x24   : > { %811 = vmatprep.subr.bf16.mxu0 %v941_v3 }
  0x27   : > { %812 = vmatpush3.bf16.msra.mxu0 %v941_v3 }
  0x28   : > { %813 = vmatprep.subr.bf16.mxu0 %v942_v4 }
  0x2b   : > { %814 = vmatpush3.bf16.msra.mxu0 %v942_v4 }
  0x2c   : > { %815 = vmatprep.subr.bf16.mxu0 %v943_v7 }
  0x2f   : > { %816 = vmatpush3.bf16.msra.mxu0 %v943_v7 }
  0x30   : > { %817 = vmatprep.subr.bf16.mxu0 %v944_v8 }
  0x33   : > { %818 = vmatpush3.bf16.msra.mxu0 %v944_v8 }
  0x34   : > { %819 = vmatprep.subr.bf16.mxu0 %v945_v9 }
  0x37   : > { %820 = vmatpush3.bf16.msra.mxu0 %v945_v9 }
  0x38   : > { %821 = vmatprep.subr.bf16.mxu0 %v946_v10 }
  0x3b   : > { %822 = vmatpush3.bf16.msra.mxu0 %v946_v10 }
  0x3e   : > { %824 = vmatmul.mubr.bf16.vlgmr.msra.gmra.mxu0 %v353_v11 }
  0xfe   : > { %v825_v13 = vpop.f32.mrf.mxu0 }
  0xff   : > { %v473_v15 = vadd.f32 %v825_v13, %v356_v12 }
 0x100   : > { %v456_v16 = vpop.f32.mrf.mxu0 }
 0x101   : > { %477 = vst [vmem:[#allocation2 + $0x18] sm:$0xff] %v473_v15  ;;  %v471_v18 = vadd.f32 %v456_v16, %v354_v14 }
 0x102   : > { %v826_v19 = vpop.f32.mrf.mxu0 }
 0x103   : > { %475 = vst [vmem:[#allocation2 + $0x10] sm:$0xff] %v471_v18  ;;  %v474_v21 = vadd.f32 %v826_v19, %v357_v17  ;;  %482 = sbr.rel (%p773_p10) target bundleno = 498 (0x1f2), region = 52 }
 0x104   : > { %v459_v22 = vpop.f32.mrf.mxu0 }
 0x105   : > { %478 = vst [vmem:[#allocation2 + $0x8] sm:$0xff] %v474_v21  ;;  %v472_v23 = vadd.f32 %v459_v22, %v355_v20 }
 0x107   : > { %476 = vst [vmem:[#allocation2] sm:$0xff] %v472_v23 }
 0x108   : > { %v534_v24 = vld [vmem:[%s1176_s4 + $0x78] sm:$0xff]  ;;  %v533_v25 = vld [vmem:[%s1176_s4 + $0x70] sm:$0xff]  ;;  %v532_v26 = vld [vmem:[%s1176_s4 + $0x68] sm:$0xff]  ;;  %v990_v46 = vmov 0  }
 0x109   : > { %827 = vmatprep.subr.mxu0 %v534_v24  ;;  %865 = vmatprep.subr.mxu1 %v534_v24  ;;  %v531_v27 = vld [vmem:[%s1176_s4 + $0x60] sm:$0xff]  ;;  %v530_v28 = vld [vmem:[%s1176_s4 + $0x58] sm:$0xff]  ;;  %v529_v29 = vld [vmem:[%s1176_s4 + $0x50] sm:$0xff] }
 0x10a   : > { %828 = vmatpush3.msra.mxu0 %v534_v24  ;;  %881 = vmatpush3.msra.mxu1 %v534_v24  ;;  %v528_v30 = vld [vmem:[%s1176_s4 + $0x48] sm:$0xff]  ;;  %v527_v31 = vld [vmem:[%s1176_s4 + $0x40] sm:$0xff]  ;;  %v526_v32 = vld [vmem:[%s1176_s4 + $0x38] sm:$0xff] }
 0x10b   : > { %829 = vmatprep.subr.mxu0 %v533_v25  ;;  %866 = vmatprep.subr.mxu1 %v533_v25  ;;  %v525_v33 = vld [vmem:[%s1176_s4 + $0x30] sm:$0xff]  ;;  %v524_v34 = vld [vmem:[%s1176_s4 + $0x28] sm:$0xff]  ;;  %v523_v35 = vld [vmem:[%s1176_s4 + $0x20] sm:$0xff] }
 0x10c   : > { %830 = vmatpush3.msra.mxu0 %v533_v25  ;;  %882 = vmatpush3.msra.mxu1 %v533_v25  ;;  %v522_v36 = vld [vmem:[%s1176_s4 + $0x18] sm:$0xff]  ;;  %v521_v37 = vld [vmem:[%s1176_s4 + $0x10] sm:$0xff]  ;;  %v520_v38 = vld [vmem:[%s1176_s4 + $0x8] sm:$0xff] }
 0x10d   : > { %831 = vmatprep.subr.mxu0 %v532_v26  ;;  %867 = vmatprep.subr.mxu1 %v532_v26  ;;  %v519_v39 = vld [vmem:[%s1176_s4] sm:$0xff]  ;;  %v517_v41 = vld [vmem:[%s1077_s7 + $0x10] sm:$0xff]  ;;  %v516_v42 = vld [vmem:[%s1077_s7 + $0x8] sm:$0xff] }
 0x10e   : > { %832 = vmatpush3.msra.mxu0 %v532_v26  ;;  %883 = vmatpush3.msra.mxu1 %v532_v26  ;;  %v515_v40 = vld [vmem:[%s1077_s7] sm:$0xff]  ;;  %v518_v43 = vld [vmem:[%s1077_s7 + $0x18] sm:$0xff]  ;;  %v489_v45 = vld [vmem:[%s1067_s16 + $0x10] sm:$0xff] }
 0x10f   : > { %833 = vmatprep.subr.mxu0 %v531_v27  ;;  %868 = vmatprep.subr.mxu1 %v531_v27  ;;  %v487_v44 = vld [vmem:[%s1067_s16] sm:$0xff]  ;;  %v488_v47 = vld [vmem:[%s1067_s16 + $0x8] sm:$0xff]  ;;  %v490_v48 = vld [vmem:[%s1067_s16 + $0x18] sm:$0xff] }
 0x110   : > { %834 = vmatpush3.msra.mxu0 %v531_v27  ;;  %884 = vmatpush3.msra.mxu1 %v531_v27  ;;  %v484_v52 = vld [vmem:[#allocation2] sm:$0xff]  ;;  %v485_v53 = vld [vmem:[#allocation2 + $0x18] sm:$0xff]  ;;  %v486_v55 = vld [vmem:[#allocation2 + $0x8] sm:$0xff] }
 0x111   : > { %835 = vmatprep.subr.mxu0 %v530_v28  ;;  %869 = vmatprep.subr.mxu1 %v530_v28  ;;  %v483_v56 = vld [vmem:[#allocation2 + $0x10] sm:$0xff]  ;;  %v774_v2 = vld [vmem:[%s1177_s5] ss:$0 sm:$0xff] }
 0x112   : > { %836 = vmatpush3.msra.mxu0 %v530_v28  ;;  %885 = vmatpush3.msra.mxu1 %v530_v28 }
 0x113   : > { %837 = vmatprep.subr.mxu0 %v529_v29  ;;  %870 = vmatprep.subr.mxu1 %v529_v29 }
 0x114   : > { %838 = vmatpush3.msra.mxu0 %v529_v29  ;;  %886 = vmatpush3.msra.mxu1 %v529_v29 }
 0x115   : > { %839 = vmatprep.subr.mxu0 %v528_v30  ;;  %871 = vmatprep.subr.mxu1 %v528_v30 }
 0x116   : > { %840 = vmatpush3.msra.mxu0 %v528_v30  ;;  %887 = vmatpush3.msra.mxu1 %v528_v30 }
 0x117   : > { %841 = vmatprep.subr.mxu0 %v527_v31  ;;  %872 = vmatprep.subr.mxu1 %v527_v31 }
 0x118   : > { %842 = vmatpush3.msra.mxu0 %v527_v31  ;;  %888 = vmatpush3.msra.mxu1 %v527_v31 }
 0x119   : > { %843 = vmatprep.subr.mxu0 %v526_v32  ;;  %873 = vmatprep.subr.mxu1 %v526_v32 }
 0x11a   : > { %844 = vmatpush3.msra.mxu0 %v526_v32  ;;  %889 = vmatpush3.msra.mxu1 %v526_v32 }
 0x11b   : > { %845 = vmatprep.subr.mxu0 %v525_v33  ;;  %874 = vmatprep.subr.mxu1 %v525_v33 }
 0x11c   : > { %846 = vmatpush3.msra.mxu0 %v525_v33  ;;  %890 = vmatpush3.msra.mxu1 %v525_v33 }
 0x11d   : > { %847 = vmatprep.subr.mxu0 %v524_v34  ;;  %875 = vmatprep.subr.mxu1 %v524_v34 }
 0x11e   : > { %848 = vmatpush3.msra.mxu0 %v524_v34  ;;  %891 = vmatpush3.msra.mxu1 %v524_v34 }
 0x11f   : > { %849 = vmatprep.subr.mxu0 %v523_v35  ;;  %876 = vmatprep.subr.mxu1 %v523_v35 }
 0x120   : > { %850 = vmatpush3.msra.mxu0 %v523_v35  ;;  %892 = vmatpush3.msra.mxu1 %v523_v35 }
 0x121   : > { %851 = vmatprep.subr.mxu0 %v522_v36  ;;  %877 = vmatprep.subr.mxu1 %v522_v36 }
 0x122   : > { %852 = vmatpush3.msra.mxu0 %v522_v36  ;;  %893 = vmatpush3.msra.mxu1 %v522_v36 }
 0x123   : > { %853 = vmatprep.subr.mxu0 %v521_v37  ;;  %878 = vmatprep.subr.mxu1 %v521_v37 }
 0x124   : > { %854 = vmatpush3.msra.mxu0 %v521_v37  ;;  %894 = vmatpush3.msra.mxu1 %v521_v37 }
 0x125   : > { %855 = vmatprep.subr.mxu0 %v520_v38  ;;  %879 = vmatprep.subr.mxu1 %v520_v38 }
 0x126   : > { %856 = vmatpush3.msra.mxu0 %v520_v38  ;;  %895 = vmatpush3.msra.mxu1 %v520_v38 }
 0x127   : > { %857 = vmatprep.subr.mxu0 %v519_v39  ;;  %880 = vmatprep.subr.mxu1 %v519_v39 }
 0x128   : > { %858 = vmatpush3.msra.mxu0 %v519_v39  ;;  %896 = vmatpush3.msra.mxu1 %v519_v39 }
 0x129   : > { %859 = vmatprep.mubr.f32.mxu0 %v515_v40  ;;  %862 = vmatprep.mubr.f32.mxu1 %v517_v41 }
 0x12a   : > { %860 = vmatmul.mubr.f32.vlgmr.msra.gmra.mxu0 %v516_v42  ;;  %863 = vmatmul.mubr.f32.vlgmr.msra.gmra.mxu1 %v518_v43 }
 0x12b   : > { %947 = vset.pattern.permute.xlu0 %v990_v46  ;;  %948 = vset.pattern.permute.xlu1 %v990_v46 }
 0x12c   : > { %493 = vperm.xlu0 %947, %v487_v44   ;;  %503 = vperm.xlu1 %948, %v489_v45  }
 0x130   : > { %498 = vperm.xlu0 %947, %v488_v47   ;;  %508 = vperm.xlu1 %948, %v490_v48  }
 0x1a7   : > { %v494_v49 = vpop.permute.xlu0 %493  ;;  %v504_v50 = vpop.permute.xlu1 %503 }
 0x1a8   : > { %v513_v58 = vmul.f32 %v504_v50, %v485_v53  ;;  %v511_v62 = vmul.f32 %v494_v49, %v483_v56 }
 0x1ab   : > { %v499_v51 = vpop.permute.xlu0 %498  ;;  %v509_v54 = vpop.permute.xlu1 %508 }
 0x1ac   : > { %v512_v57 = vmul.f32 %v499_v51, %v484_v52  ;;  %v514_v59 = vmul.f32 %v509_v54, %v486_v55 }
 0x1ea   : > { %v861_v60 = vpop.f32.mrf.mxu0  ;;  %v864_v61 = vpop.f32.mrf.mxu1 }
 0x1eb   : > { %v621_v63 = vadd.f32 %v861_v60, %v512_v57  ;;  %v623_v5 = vadd.f32 %v864_v61, %v514_v59 }
 0x1ec   : > { %v601_v0 = vpop.f32.mrf.mxu0  ;;  %v611_v1 = vpop.f32.mrf.mxu1 }
 0x1ed   : > { %v620_v3 = vadd.f32 %v601_v0, %v511_v62  ;;  %v622_v4 = vadd.f32 %v611_v1, %v513_v58  ;;  %v632_v7 = vadd.f32 %v774_v2, %v621_v63  ;;  %v634_v9 = vadd.f32 %v774_v2, %v623_v5 }
 0x1ef   : > { %v631_v6 = vadd.f32 %v774_v2, %v620_v3  ;;  %v633_v8 = vadd.f32 %v774_v2, %v622_v4  ;;  %636 = vst [vmem:[%s1082_s28 + $0x8] sm:$0xff] %v632_v7  ;;  %638 = vst [vmem:[%s1082_s28 + $0x18] sm:$0xff] %v634_v9 }
 0x1f1   : > { %635 = vst [vmem:[%s1082_s28] sm:$0xff] %v631_v6  ;;  %637 = vst [vmem:[%s1082_s28 + $0x10] sm:$0xff] %v633_v8 }
 0x1f2 PF: > { %s16_s25 = sadd.s32 1, %s987_s25   ;;  %s1179_s21 = smov %s979_s23 }
 0x1f3   : > { %p13_p11 = scmp.ge.s32.totalorder %s16_s25, 6   ;;  %s1180_s22 = smov %s983_s24 }
 0x1f4   : > { %s1181_s23 = smov %s1184_s26  ;;  %s1182_s24 = smov %s1188_s27 }
 0x1f5   :  { %15 = sbr.rel (!%p13_p11) target bundleno = 3 (0x3), region = 91 }

// kernel: rgcn_embed_forward.2
= control target key start
LH: loop header
LB: loop body
LE: loop exit
PB: predicated region body
PF: predicated region fallthrough
CT: control target
= control target key end

     0   :  { %s2479_s0 = inlined_call_operand.vmem [shape: s8[64,256], index: 0, kind: input, shape index: {}]   ;;  %s2480_s1 = inlined_call_operand.vmem [shape: f32[64,1], index: 1, kind: input, shape index: {}]   ;;  %s2481_s2 = inlined_call_operand.vmem [shape: bf16[256,128], index: 2, kind: input, shape index: {}]   ;;  %s2482_s3 = inlined_call_operand.vmem [shape: f32[64,128], index: 3, kind: input, shape index: {}]   ;;  %s2483_s4 = inlined_call_operand.vmem [shape: f32[128,128], index: 4, kind: input, shape index: {}]   ;;  %s2484_s5 = inlined_call_operand.vmem [shape: f32[1,128], index: 5, kind: input, shape index: {}]   ;;  %s2485_s6 = inlined_call_operand.hbm [shape: f32[4,128,128], index: 6, kind: input, shape index: {}]   ;;  %s2486_s7 = inlined_call_operand.vmem [shape: f32[64,128], index: 7, kind: output, shape index: {0}]   ;;  %s2487_s8 = inlined_call_operand.vmem [shape: bf16[4,64,128], index: 8, kind: output, shape index: {1}]  }
   0x1   :  { %2491 = sst [smem:[#allocation12_spill]] %s2485_s6 }
   0x2   :  { %14 = vsyncpa [#allocation4], 0  ;;  %s2166_s27 = smov 0   ;;  %s2168_s28 = smov 0  }
   0x3   :  { %s2170_s29 = smov 0   ;;  %s2172_s30 = smov 0  }
   0x4   :  { %s2174_s9 = smov 0   ;;  %s2176_s10 = smov 0  }
   0x5   :  { %s2178_s11 = smov 0  }
   0x6 LB: > { %2492 = sst [smem:[#allocation7_spill]] %s2106_s9  ;;  %s1471_s12 = sadd.s32 4294967295, %s2114_s11   ;;  %s2114_s11 = sphi %s2178_s11, %s20_s11   ;;  %s2110_s10 = sphi %s2176_s10, %s2505_s10   ;;  %s2106_s9 = sphi %s2174_s9, %s2504_s9   ;;  %s2102_s30 = sphi %s2172_s30, %s2508_s30   ;;  %s2098_s29 = sphi %s2170_s29, %s2502_s29   ;;  %s2094_s28 = sphi %s2168_s28, %s2507_s28   ;;  %s2090_s27 = sphi %s2166_s27, %s2506_s27  }
   0x7   : > { %2493 = sst [smem:[#allocation8_spill]] %s2110_s10  ;;  %s29_s13 = sadd.s32 1, %s2106_s9 }
   0x8   : > { %p30_p0 = scmp.ge.s32.totalorder %s29_s13, 2  ;;  %s32_s14 = sadd.s32 1, %s2110_s10 }
   0x9   : > { %s234_s15 = sadd.s32 1, %s2094_s28  ;;  %p244_p1 = scmp.ne.s32.totalorder %s2094_s28, %s2090_s27 }
   0xa   : > { %s2510_s13 = smov (%p30_p0, %s29_s13), 0  ;;  %s2512_s14 = smov (!%p30_p0, %s32_s14), %s2110_s10 }
   0xb   : > { %2494 = sst [smem:[#allocation9_spill]] %s2510_s13  ;;  %p245_p2 = scmp.eq.s32.totalorder %s1471_s12, 3 }
   0xc   : > { %p1473_p3 = scmp.ge.s32.totalorder %s2114_s11, 1  ;;  %p34_p4 = scmp.ge.s32.totalorder %s2512_s14, 2 }
   0xd   : > { %p258_p5 = scmp.lt.s32.totalorder %s2114_s11, 5  ;;  %p2212_p6 = por %p245_p2, %p244_p1 }
   0xe   : > { %s2514_s14 = smov (%p34_p4, %s2512_s14), 0  ;;  %p2222_p8 = scmp.eq.s32.totalorder %s1471_s12, 0 }
   0xf   : > { %2496 = sst [smem:[#allocation10_spill]] %s2514_s14  ;;  %p2218_p7 = pnand %p1473_p3, %p258_p5 }
  0x10   : > { %s231_s19 = ssub.s32 %s2110_s10, %s2514_s14  ;;  %s2116_s20 = smov [#allocation3]  }
  0x11   : > { %p232_p9 = scmp.eq.s32.totalorder %s231_s19, 0  ;;  %p1953_p10 = pneg %p2218_p7 }
  0x12   : > { %s276_s21 = sshll.u32 %s2116_s20, 4  ;;  %s277_s21 = int_to_ptr.vmem [resolvable:$true] %s276_s21 }
  0x13   : > { %s2231_s22 = scalar_select %p232_p9, %s2094_s28, %s234_s15  }
  0x14   : > { %p1954_p11 = pnand %p2222_p8, %p1953_p10  ;;  %s2041_s23 = scalar_lea.vmem %s277_s21, 8192 }
  0x15   : > { %2499 = sst [smem:[#allocation11_spill]] %s2231_s22  ;;  %p2042_p13 = scmp.ne.s32.totalorder %s277_s21, %s2041_s23 }
  0x16   : > { %p2032_p12 = pneg %p1954_p11  ;;  %p2049_p2 = scmp.lt.s32.totalorder %s277_s21, %s277_s21 }
  0x17   : > { %p2050_p3 = scmp.lt.s32.totalorder %s2041_s23, %s2041_s23 }
  0x18   : > { %p2044_p0 = pnand %p2042_p13, %p2032_p12 }
  0x19   : > { %p2051_p4 = por %p2050_p3, %p2049_p2 }
  0x1a   : > { %p2045_p1 = pneg %p2044_p0 }
  0x1c   : > { %p2052_p5 = pnand %p2051_p4, %p2045_p1 }
  0x1e   : > { %2055 = shalt.err (!%p2052_p5)
}
  0x1f   : > { %s2117_s24 = smov 128   ;;  %s2118_s25 = smov 8  }
  0x20   : > { %s2500_s6 = sld [smem:[#allocation12_spill]] }
  0x22   : > { %330 = sbr.rel (%p2218_p7) target bundleno = 806 (0x326), region = 48 }
  0x26   : > { %1956 = dma.hbm_to_vmem [thread:$0]  (!%p1954_p11), %s2500_s6, 8192, %s277_s21, [#allocation4], %s2117_s24, %s2117_s24, %s2118_s25  }
  0x27   : > { %2085 = dma.done.wait (%p2222_p8), [#allocation4], 8192  }
  0x28   : > { %2087 = vsyncadd (%p2222_p8), [#allocation4], 4294959104  ;;  %s383_s15 = sand.u32 1, %s2090_s27   ;;  %p386_p9 = scmp.lt.s32.totalorder %s2102_s30, 1 }
  0x29   : > { %s1478_s19 = sshll.u32 %s383_s15, 6  ;;  %p388_p10 = scmp.lt.s32.totalorder %s2098_s29, 1 }
  0x2a   : > { %s1481_s20 = sshll.u32 %s2102_s30, 2  ;;  %s1483_s25 = sshll.u32 %s2098_s29, 4 }
  0x2b   : > { %s387_s17 = scalar_select %p386_p9, %s2102_s30, 1 }
  0x2c   : > { %s389_s21 = scalar_select %p388_p10, %s2098_s29, 1 }
  0x2d   : > { %s1479_s23 = sshll.u32 %s387_s17, 1  ;;  %p395_p7 = scmp.lt.s32.totalorder %s1481_s20, 7 }
  0x2e   : > { %s391_s24 = sadd.s32 %s1479_s23, %s389_s21  ;;  %p401_p8 = scmp.lt.s32.totalorder %s1483_s25, 31 }
  0x2f   : > { %s1480_s18 = sshll.u32 %s391_s24, 3  ;;  %s2516_s20 = smov (!%p395_p7, %s1481_s20), 7 }
  0x30   : > { %s393_s6 = scalar_lea.vmem %s2479_s0, %s1480_s18  ;;  %s2518_s25 = smov (!%p401_p8, %s1483_s25), 31 }
  0x31   : > { %s1482_s14 = sshll.u32 %s2516_s20, 3  ;;  %s1484_s10 = sshll.u32 %s2518_s25, 2 }
  0x32   : > { %s2257_s15 = scalar_lea.vmem %s2480_s1, %s1482_s14  ;;  %s2262_s21 = scalar_lea.vmem %s2481_s2, %s1484_s10 }
  0x33   : > { %s2267_s22 = scalar_lea.vmem %s2482_s3, %s1482_s14  ;;  %s2272_s20 = scalar_lea.vmem %s2486_s7, %s1482_s14 }
  0x34   : > { %s2274_s12 = scalar_lea.vmem [#allocation5], %s1478_s19  ;;  %p1489_p11 = scmp.ne.s32.totalorder %s2098_s29, 0 }
  0x36   : > { %423 = sbr.rel (%p1489_p11) target bundleno = 62 (0x3e), region = 56 }
  0x3b   : > { %v2119_v0 = vmov 0.0  }
  0x3c   : > { %424 = vst [vmem:[#allocation2 + $0x10] sm:$0xff] %v2119_v0  ;;  %425 = vst [vmem:[#allocation2] sm:$0xff] %v2119_v0 }
  0x3d   : > { %426 = vst [vmem:[#allocation2 + $0x18] sm:$0xff] %v2119_v0  ;;  %427 = vst [vmem:[#allocation2 + $0x8] sm:$0xff] %v2119_v0 }
  0x3e PF: > { %v2020_v1 = vld [vmem:[%s2262_s21 + $0x38] sm:$0xff]   ;;  %v2021_v2 = vld [vmem:[%s2262_s21 + $0x30] sm:$0xff]   ;;  %v2022_v3 = vld [vmem:[%s2262_s21 + $0x28] sm:$0xff]   ;;  %p1498_p12 = scmp.ne.s32.totalorder %s2098_s29, 1 }
  0x3f   : > { %1707 = vmatprep.subr.bf16.mxu0 %v2020_v1  ;;  %v2023_v4 = vld [vmem:[%s2262_s21 + $0x20] sm:$0xff]   ;;  %v2024_v7 = vld [vmem:[%s2262_s21 + $0x18] sm:$0xff]   ;;  %v2025_v8 = vld [vmem:[%s2262_s21 + $0x10] sm:$0xff]  }
  0x40   : > { %1708 = vmatpush3.bf16.msra.mxu0 %v2020_v1  ;;  %v428_v5 = vld [vmem:[%s393_s6] sm:$0xff]  ;;  %v2026_v9 = vld [vmem:[%s2262_s21 + $0x8] sm:$0xff]  }
  0x41   : > { %1709 = vmatprep.subr.bf16.mxu0 %v2021_v2  ;;  %v429_v6 = vunpack.c.l.s8.bf16 %v428_v5  ;;  %v2027_v10 = vld [vmem:[%s2262_s21] sm:$0xff]   ;;  %v430_v11 = vunpack.c.h.s8.bf16 %v428_v5 }
  0x43   : > { %1723 = vmatprep.mubr.bf16.mxu0 %v429_v6  ;;  %v431_v14 = vld [vmem:[#allocation2 + $0x10] sm:$0xff]  ;;  %v432_v20 = vld [vmem:[#allocation2] sm:$0xff] }
  0x44   : > { %1710 = vmatpush3.bf16.msra.mxu0 %v2021_v2  ;;  %v433_v12 = vld [vmem:[#allocation2 + $0x18] sm:$0xff]  ;;  %v434_v17 = vld [vmem:[#allocation2 + $0x8] sm:$0xff] }
  0x45   : > { %1711 = vmatprep.subr.bf16.mxu0 %v2022_v3 }
  0x48   : > { %1712 = vmatpush3.bf16.msra.mxu0 %v2022_v3 }
  0x49   : > { %1713 = vmatprep.subr.bf16.mxu0 %v2023_v4 }
  0x4c   : > { %1714 = vmatpush3.bf16.msra.mxu0 %v2023_v4 }
  0x4d   : > { %1715 = vmatprep.subr.bf16.mxu0 %v2024_v7 }
  0x50   : > { %1716 = vmatpush3.bf16.msra.mxu0 %v2024_v7 }
  0x51   : > { %1717 = vmatprep.subr.bf16.mxu0 %v2025_v8 }
  0x54   : > { %1718 = vmatpush3.bf16.msra.mxu0 %v2025_v8 }
  0x55   : > { %1719 = vmatprep.subr.bf16.mxu0 %v2026_v9 }
  0x58   : > { %1720 = vmatpush3.bf16.msra.mxu0 %v2026_v9 }
  0x59   : > { %1721 = vmatprep.subr.bf16.mxu0 %v2027_v10 }
  0x5c   : > { %1722 = vmatpush3.bf16.msra.mxu0 %v2027_v10 }
  0x5f   : > { %1724 = vmatmul.mubr.bf16.vlgmr.msra.gmra.mxu0 %v430_v11 }
 0x11f   : > { %v1725_v13 = vpop.f32.mrf.mxu0 }
 0x120   : > { %v550_v15 = vadd.f32 %v1725_v13, %v433_v12 }
 0x121   : > { %v533_v16 = vpop.f32.mrf.mxu0 }
 0x122   : > { %554 = vst [vmem:[#allocation2 + $0x18] sm:$0xff] %v550_v15  ;;  %v548_v18 = vadd.f32 %v533_v16, %v431_v14 }
 0x123   : > { %v1726_v19 = vpop.f32.mrf.mxu0 }
 0x124   : > { %552 = vst [vmem:[#allocation2 + $0x10] sm:$0xff] %v548_v18  ;;  %v551_v21 = vadd.f32 %v1726_v19, %v434_v17  ;;  %559 = sbr.rel (%p1498_p12) target bundleno = 798 (0x31e), region = 60 }
 0x125   : > { %v536_v22 = vpop.f32.mrf.mxu0 }
 0x126   : > { %555 = vst [vmem:[#allocation2 + $0x8] sm:$0xff] %v551_v21  ;;  %v549_v23 = vadd.f32 %v536_v22, %v432_v20 }
 0x128   : > { %553 = vst [vmem:[#allocation2] sm:$0xff] %v549_v23 }
 0x129   : > { %v611_v24 = vld [vmem:[%s2483_s4 + $0x78] sm:$0xff]  ;;  %v610_v25 = vld [vmem:[%s2483_s4 + $0x70] sm:$0xff]  ;;  %v2120_v26 = vmov 0   ;;  %v609_v27 = vld [vmem:[%s2483_s4 + $0x68] sm:$0xff] }
 0x12a   : > { %1727 = vmatprep.subr.mxu0 %v611_v24  ;;  %2028 = vset.pattern.permute.xlu0 %v2120_v26  ;;  %v608_v28 = vld [vmem:[%s2483_s4 + $0x60] sm:$0xff]  ;;  %v607_v30 = vld [vmem:[%s2483_s4 + $0x58] sm:$0xff]  ;;  %v566_v32 = vld [vmem:[%s2257_s15 + $0x10] sm:$0xff] }
 0x12b   : > { %1728 = vmatpush3.msra.mxu0 %v611_v24  ;;  %2029 = vset.pattern.permute.xlu1 %v2120_v26  ;;  %v592_v29 = vld [vmem:[%s2267_s22] sm:$0xff]  ;;  %v606_v33 = vld [vmem:[%s2483_s4 + $0x50] sm:$0xff]  ;;  %v565_v34 = vld [vmem:[%s2257_s15 + $0x8] sm:$0xff] }
 0x12c   : > { %1729 = vmatprep.subr.mxu0 %v610_v25  ;;  %1759 = vmatprep.mubr.f32.mxu0 %v592_v29  ;;  %v564_v31 = vld [vmem:[%s2257_s15] sm:$0xff]  ;;  %v735_v35 = vld [vmem:[#allocation3 + $0x78] sm:$0xff]  ;;  %v605_v37 = vld [vmem:[%s2483_s4 + $0x48] sm:$0xff] }
 0x12d   : > { %1730 = vmatpush3.msra.mxu0 %v610_v25  ;;  %570 = vperm.xlu0 %2028, %v564_v31   ;;  %v567_v36 = vld [vmem:[%s2257_s15 + $0x18] sm:$0xff]  ;;  %v734_v38 = vld [vmem:[#allocation3 + $0x70] sm:$0xff]  ;;  %v604_v39 = vld [vmem:[%s2483_s4 + $0x40] sm:$0xff] }
 0x12e   : > { %1731 = vmatprep.subr.mxu0 %v609_v27  ;;  %580 = vperm.xlu1 %2029, %v566_v32   ;;  %v733_v40 = vld [vmem:[#allocation3 + $0x68] sm:$0xff]  ;;  %v603_v41 = vld [vmem:[%s2483_s4 + $0x38] sm:$0xff]  ;;  %v732_v42 = vld [vmem:[#allocation3 + $0x60] sm:$0xff] }
 0x12f   : > { %1732 = vmatpush3.msra.mxu0 %v609_v27  ;;  %1765 = vmatprep.subr.mxu1 %v735_v35  ;;  %v602_v43 = vld [vmem:[%s2483_s4 + $0x30] sm:$0xff]  ;;  %v731_v44 = vld [vmem:[#allocation3 + $0x58] sm:$0xff]  ;;  %v601_v45 = vld [vmem:[%s2483_s4 + $0x28] sm:$0xff] }
 0x130   : > { %1733 = vmatprep.subr.mxu0 %v608_v28  ;;  %1766 = vmatpush3.msra.mxu1 %v735_v35  ;;  %v730_v46 = vld [vmem:[#allocation3 + $0x50] sm:$0xff]  ;;  %v600_v47 = vld [vmem:[%s2483_s4 + $0x20] sm:$0xff]  ;;  %v729_v48 = vld [vmem:[#allocation3 + $0x48] sm:$0xff] }
 0x131   : > { %1734 = vmatpush3.msra.mxu0 %v608_v28  ;;  %575 = vperm.xlu0 %2028, %v565_v34   ;;  %v599_v49 = vld [vmem:[%s2483_s4 + $0x18] sm:$0xff]  ;;  %v728_v50 = vld [vmem:[#allocation3 + $0x40] sm:$0xff]  ;;  %v598_v51 = vld [vmem:[%s2483_s4 + $0x10] sm:$0xff] }
 0x132   : > { %1735 = vmatprep.subr.mxu0 %v607_v30  ;;  %585 = vperm.xlu1 %2029, %v567_v36   ;;  %v727_v52 = vld [vmem:[#allocation3 + $0x38] sm:$0xff]  ;;  %v597_v53 = vld [vmem:[%s2483_s4 + $0x8] sm:$0xff]  ;;  %v726_v54 = vld [vmem:[#allocation3 + $0x30] sm:$0xff] }
 0x133   : > { %1736 = vmatpush3.msra.mxu0 %v607_v30  ;;  %1767 = vmatprep.subr.mxu1 %v734_v38  ;;  %v596_v55 = vld [vmem:[%s2483_s4] sm:$0xff]  ;;  %v725_v56 = vld [vmem:[#allocation3 + $0x28] sm:$0xff]  ;;  %v857_v58 = vld [vmem:[#allocation3 + $0xf8] sm:$0xff] }
 0x134   : > { %1737 = vmatprep.subr.mxu0 %v606_v33  ;;  %1768 = vmatpush3.msra.mxu1 %v734_v38  ;;  %v593_v57 = vld [vmem:[%s2267_s22 + $0x8] sm:$0xff]  ;;  %v594_v59 = vld [vmem:[%s2267_s22 + $0x10] sm:$0xff]  ;;  %v724_v61 = vld [vmem:[#allocation3 + $0x20] sm:$0xff] }
 0x135   : > { %1738 = vmatpush3.msra.mxu0 %v606_v33  ;;  %1769 = vmatprep.subr.mxu1 %v733_v40  ;;  %v856_v60 = vld [vmem:[#allocation3 + $0xf0] sm:$0xff]  ;;  %v595_v62 = vld [vmem:[%s2267_s22 + $0x18] sm:$0xff]  ;;  %v855_v63 = vld [vmem:[#allocation3 + $0xe8] sm:$0xff] }
 0x136   : > { %1739 = vmatprep.subr.mxu0 %v605_v37  ;;  %1770 = vmatpush3.msra.mxu1 %v733_v40  ;;  %v854_v0 = vld [vmem:[#allocation3 + $0xe0] sm:$0xff]  ;;  %v853_v1 = vld [vmem:[#allocation3 + $0xd8] sm:$0xff]  ;;  %v852_v2 = vld [vmem:[#allocation3 + $0xd0] sm:$0xff] }
 0x137   : > { %1740 = vmatpush3.msra.mxu0 %v605_v37  ;;  %1771 = vmatprep.subr.mxu1 %v732_v42  ;;  %v851_v3 = vld [vmem:[#allocation3 + $0xc8] sm:$0xff]  ;;  %v850_v4 = vld [vmem:[#allocation3 + $0xc0] sm:$0xff]  ;;  %v849_v5 = vld [vmem:[#allocation3 + $0xb8] sm:$0xff] }
 0x138   : > { %1741 = vmatprep.subr.mxu0 %v604_v39  ;;  %1772 = vmatpush3.msra.mxu1 %v732_v42  ;;  %v848_v6 = vld [vmem:[#allocation3 + $0xb0] sm:$0xff]  ;;  %v847_v7 = vld [vmem:[#allocation3 + $0xa8] sm:$0xff]  ;;  %v846_v8 = vld [vmem:[#allocation3 + $0xa0] sm:$0xff] }
 0x139   : > { %1742 = vmatpush3.msra.mxu0 %v604_v39  ;;  %1773 = vmatprep.subr.mxu1 %v731_v44  ;;  %v723_v9 = vld [vmem:[#allocation3 + $0x18] sm:$0xff]  ;;  %v722_v11 = vld [vmem:[#allocation3 + $0x10] sm:$0xff]  ;;  %v721_v13 = vld [vmem:[#allocation3 + $0x8] sm:$0xff] }
 0x13a   : > { %1743 = vmatprep.subr.mxu0 %v603_v41  ;;  %1774 = vmatpush3.msra.mxu1 %v731_v44  ;;  %v845_v10 = vld [vmem:[#allocation3 + $0x98] sm:$0xff]  ;;  %v844_v12 = vld [vmem:[#allocation3 + $0x90] sm:$0xff]  ;;  %v843_v14 = vld [vmem:[#allocation3 + $0x88] sm:$0xff] }
 0x13b   : > { %1744 = vmatpush3.msra.mxu0 %v603_v41  ;;  %1775 = vmatprep.subr.mxu1 %v730_v46  ;;  %v720_v15 = vld [vmem:[#allocation3] sm:$0xff]  ;;  %v980_v17 = vld [vmem:[#allocation3 + $0x178] sm:$0xff]  ;;  %v560_v24 = vld [vmem:[#allocation2 + $0x10] sm:$0xff] }
 0x13c   : > { %1745 = vmatprep.subr.mxu0 %v602_v43  ;;  %1776 = vmatpush3.msra.mxu1 %v730_v46  ;;  %v842_v16 = vld [vmem:[#allocation3 + $0x80] sm:$0xff]  ;;  %v2342_v18 = vld [vmem:[#allocation3 + $0x1f8] sm:$0xff]  ;;  %v563_v26 = vld [vmem:[#allocation2 + $0x8] sm:$0xff] }
 0x13d   : > { %1746 = vmatpush3.msra.mxu0 %v602_v43  ;;  %1777 = vmatprep.subr.mxu1 %v729_v48  ;;  %v561_v22 = vld [vmem:[#allocation2] sm:$0xff]  ;;  %v562_v28 = vld [vmem:[#allocation2 + $0x18] sm:$0xff]  ;;  %v979_v46 = vld [vmem:[#allocation3 + $0x170] sm:$0xff] }
 0x13e   : > { %1747 = vmatprep.subr.mxu0 %v601_v45  ;;  %1778 = vmatpush3.msra.mxu1 %v729_v48  ;;  %v1499_v31 = vld [vmem:[%s2484_s5] ss:$0 sm:$0xff] }
 0x13f   : > { %1748 = vmatpush3.msra.mxu0 %v601_v45  ;;  %1779 = vmatprep.subr.mxu1 %v728_v50 }
 0x140   : > { %1749 = vmatprep.subr.mxu0 %v600_v47  ;;  %1780 = vmatpush3.msra.mxu1 %v728_v50  ;;  %v978_v50 = vld [vmem:[#allocation3 + $0x168] sm:$0xff] }
 0x141   : > { %1750 = vmatpush3.msra.mxu0 %v600_v47  ;;  %1781 = vmatprep.subr.mxu1 %v727_v52  ;;  %v2351_v47 = vld [vmem:[#allocation3 + $0x1f0] sm:$0xff] }
 0x142   : > { %1751 = vmatprep.subr.mxu0 %v599_v49  ;;  %1782 = vmatpush3.msra.mxu1 %v727_v52  ;;  %v977_v52 = vld [vmem:[#allocation3 + $0x160] sm:$0xff] }
 0x143   : > { %1752 = vmatpush3.msra.mxu0 %v599_v49  ;;  %1783 = vmatprep.subr.mxu1 %v726_v54 }
 0x144   : > { %1753 = vmatprep.subr.mxu0 %v598_v51  ;;  %1784 = vmatpush3.msra.mxu1 %v726_v54  ;;  %v976_v54 = vld [vmem:[#allocation3 + $0x158] sm:$0xff] }
 0x145   : > { %1754 = vmatpush3.msra.mxu0 %v598_v51  ;;  %1785 = vmatprep.subr.mxu1 %v725_v56  ;;  %v2363_v51 = vld [vmem:[#allocation3 + $0x1e8] sm:$0xff] }
 0x146   : > { %1755 = vmatprep.subr.mxu0 %v597_v53  ;;  %1786 = vmatpush3.msra.mxu1 %v725_v56  ;;  %v975_v56 = vld [vmem:[#allocation3 + $0x150] sm:$0xff] }
 0x147   : > { %1756 = vmatpush3.msra.mxu0 %v597_v53  ;;  %1787 = vmatprep.subr.mxu1 %v724_v61  ;;  %v2375_v53 = vld [vmem:[#allocation3 + $0x1e0] sm:$0xff] }
 0x148   : > { %1757 = vmatprep.subr.mxu0 %v596_v55  ;;  %1788 = vmatpush3.msra.mxu1 %v724_v61  ;;  %v2390_v61 = vld [vmem:[#allocation3 + $0x1c0] sm:$0xff] }
 0x149   : > { %1758 = vmatpush3.msra.mxu0 %v596_v55  ;;  %1789 = vmatprep.subr.mxu1 %v723_v9  ;;  %v2378_v55 = vld [vmem:[#allocation3 + $0x1d8] sm:$0xff] }
 0x14a   : > { %1760 = vmatmul.mubr.f32.vlgmr.msra.gmra.mxu0 %v593_v57  ;;  %1803 = vmatprep.subr.mxu0 %v857_v58  ;;  %v2382_v57 = vld [vmem:[#allocation3 + $0x1d0] sm:$0xff] }
 0x14b   : > { %1762 = vmatprep.mubr.f32.mxu0 %v594_v59  ;;  %1804 = vmatpush3.msra.mxu0 %v857_v58  ;;  %v974_v58 = vld [vmem:[#allocation3 + $0x148] sm:$0xff] }
 0x14c   : > { %1805 = vmatprep.subr.mxu0 %v856_v60  ;;  %1790 = vmatpush3.msra.mxu1 %v723_v9  ;;  %v2386_v59 = vld [vmem:[#allocation3 + $0x1c8] sm:$0xff]  ;;  %v1090_v9 = vld [vmem:[#allocation3 + $0x190] sm:$0xff] }
 0x14d   : > { %1806 = vmatpush3.msra.mxu0 %v856_v60  ;;  %1791 = vmatprep.subr.mxu1 %v722_v11  ;;  %v973_v60 = vld [vmem:[#allocation3 + $0x140] sm:$0xff] }
 0x14e   : > { %1763 = vmatmul.mubr.f32.gmra.mxu0 %v595_v62  ;;  %1807 = vmatprep.subr.mxu0 %v855_v63  ;;  %v972_v62 = vld [vmem:[#allocation3 + $0x138] sm:$0xff] }
 0x14f   : > { %1808 = vmatpush3.msra.mxu0 %v855_v63  ;;  %1792 = vmatpush3.msra.mxu1 %v722_v11  ;;  %v2394_v63 = vld [vmem:[#allocation3 + $0x1b8] sm:$0xff]  ;;  %v1089_v11 = vld [vmem:[#allocation3 + $0x188] sm:$0xff] }
 0x150   : > { %1809 = vmatprep.subr.mxu0 %v854_v0  ;;  %1793 = vmatprep.subr.mxu1 %v721_v13 }
 0x151   : > { %1810 = vmatpush3.msra.mxu0 %v854_v0  ;;  %1794 = vmatpush3.msra.mxu1 %v721_v13  ;;  %v971_v0 = vld [vmem:[#allocation3 + $0x130] sm:$0xff]  ;;  %v1088_v13 = vld [vmem:[#allocation3 + $0x180] sm:$0xff] }
 0x152   : > { %1811 = vmatprep.subr.mxu0 %v853_v1  ;;  %1795 = vmatprep.subr.mxu1 %v720_v15 }
 0x153   : > { %1812 = vmatpush3.msra.mxu0 %v853_v1  ;;  %1796 = vmatpush3.msra.mxu1 %v720_v15  ;;  %v2398_v1 = vld [vmem:[#allocation3 + $0x1b0] sm:$0xff] }
 0x154   : > { %1813 = vmatprep.subr.mxu0 %v852_v2  ;;  %1841 = vmatprep.subr.mxu1 %v980_v17 }
 0x155   : > { %1814 = vmatpush3.msra.mxu0 %v852_v2  ;;  %v970_v2 = vld [vmem:[#allocation3 + $0x128] sm:$0xff] }
 0x156   : > { %1815 = vmatprep.subr.mxu0 %v851_v3 }
 0x157   : > { %1816 = vmatpush3.msra.mxu0 %v851_v3  ;;  %v2402_v3 = vld [vmem:[#allocation3 + $0x1a8] sm:$0xff] }
 0x158   : > { %1817 = vmatprep.subr.mxu0 %v850_v4 }
 0x159   : > { %1818 = vmatpush3.msra.mxu0 %v850_v4  ;;  %v969_v4 = vld [vmem:[#allocation3 + $0x120] sm:$0xff] }
 0x15a   : > { %1819 = vmatprep.subr.mxu0 %v849_v5 }
 0x15b   : > { %1820 = vmatpush3.msra.mxu0 %v849_v5  ;;  %v1092_v5 = vld [vmem:[#allocation3 + $0x1a0] sm:$0xff] }
 0x15c   : > { %1821 = vmatprep.subr.mxu0 %v848_v6 }
 0x15d   : > { %1822 = vmatpush3.msra.mxu0 %v848_v6  ;;  %v968_v6 = vld [vmem:[#allocation3 + $0x118] sm:$0xff] }
 0x15e   : > { %1823 = vmatprep.subr.mxu0 %v847_v7 }
 0x15f   : > { %1824 = vmatpush3.msra.mxu0 %v847_v7  ;;  %v1091_v7 = vld [vmem:[#allocation3 + $0x198] sm:$0xff] }
 0x160   : > { %1825 = vmatprep.subr.mxu0 %v846_v8 }
 0x161   : > { %1826 = vmatpush3.msra.mxu0 %v846_v8  ;;  %v967_v8 = vld [vmem:[#allocation3 + $0x110] sm:$0xff] }
 0x162   : > { %1827 = vmatprep.subr.mxu0 %v845_v10 }
 0x163   : > { %1828 = vmatpush3.msra.mxu0 %v845_v10  ;;  %v966_v10 = vld [vmem:[#allocation3 + $0x108] sm:$0xff] }
 0x164   : > { %1829 = vmatprep.subr.mxu0 %v844_v12 }
 0x165   : > { %1830 = vmatpush3.msra.mxu0 %v844_v12  ;;  %v965_v12 = vld [vmem:[#allocation3 + $0x100] sm:$0xff] }
 0x166   : > { %1831 = vmatprep.subr.mxu0 %v843_v14 }
 0x167   : > { %1832 = vmatpush3.msra.mxu0 %v843_v14 }
 0x168   : > { %1833 = vmatprep.subr.mxu0 %v842_v16 }
 0x169   : > { %1834 = vmatpush3.msra.mxu0 %v842_v16 }
 0x16a   : > { %1879 = vmatprep.subr.mxu0 %v2342_v18 }
 0x1a8   : > { %v571_v19 = vpop.permute.xlu0 %570 }
 0x1a9   : > { %v581_v20 = vpop.permute.xlu1 %580  ;;  %v588_v29 = vmul.f32 %v571_v19, %v560_v24 }
 0x1aa   : > { %v590_v34 = vmul.f32 %v581_v20, %v562_v28 }
 0x1ac   : > { %v576_v21 = vpop.permute.xlu0 %575 }
 0x1ad   : > { %v589_v23 = vmul.f32 %v576_v21, %v561_v22  ;;  %v586_v25 = vpop.permute.xlu1 %585 }
 0x1ae   : > { %v591_v32 = vmul.f32 %v586_v25, %v563_v26 }
 0x20a   : > { %v1761_v27 = vpop.f32.mrf.mxu0 }
 0x20b   : > { %v698_v30 = vadd.f32 %v1761_v27, %v589_v23 }
 0x20c   : > { %v678_v33 = vpop.f32.mrf.mxu0 }
 0x20d   : > { %v697_v35 = vadd.f32 %v678_v33, %v588_v29  ;;  %v709_v36 = vadd.f32 %v1499_v31, %v698_v30 }
 0x20e   : > { %v1764_v37 = vpop.f32.mrf.mxu0 }
 0x20f   : > { %v708_v38 = vadd.f32 %v1499_v31, %v697_v35  ;;  %v700_v39 = vadd.f32 %v1764_v37, %v591_v32  ;;  %v2348_v43 = vmax.f32 %v709_v36, 0.0 }
 0x210   : > { %v688_v40 = vpop.f32.mrf.mxu0 }
 0x211   : > { %v712_v41 = vmax.f32 %v708_v38, 0.0  ;;  %v699_v42 = vadd.f32 %v688_v40, %v590_v34  ;;  %v711_v44 = vadd.f32 %v1499_v31, %v700_v39  ;;  %717 = vst [vmem:[%s2272_s20 + $0x8] sm:$0xff] %v2348_v43 }
 0x213   : > { %716 = vst [vmem:[%s2272_s20] sm:$0xff] %v712_v41  ;;  %v710_v45 = vadd.f32 %v1499_v31, %v699_v42  ;;  %1797 = vmatprep.mubr.f32.mxu1 %v712_v41  ;;  %1835 = vmatprep.mubr.f32.mxu0 %v712_v41  ;;  %v2360_v49 = vmax.f32 %v711_v44, 0.0 }
 0x214   : > { %1798 = vmatmul.mubr.f32.vlgmr.msra.gmra.mxu1 %v2348_v43  ;;  %1836 = vmatmul.mubr.f32.vlgmr.msra.gmra.mxu0 %v2348_v43 }
 0x215   : > { %v2357_v48 = vmax.f32 %v710_v45, 0.0  ;;  %1842 = vmatpush3.msra.mxu1 %v980_v17  ;;  %1880 = vmatpush3.msra.mxu0 %v2342_v18  ;;  %719 = vst [vmem:[%s2272_s20 + $0x18] sm:$0xff] %v2360_v49 }
 0x216   : > { %1843 = vmatprep.subr.mxu1 %v979_v46  ;;  %1881 = vmatprep.subr.mxu0 %v2351_v47 }
 0x217   : > { %718 = vst [vmem:[%s2272_s20 + $0x10] sm:$0xff] %v2357_v48  ;;  %1844 = vmatpush3.msra.mxu1 %v979_v46  ;;  %1882 = vmatpush3.msra.mxu0 %v2351_v47 }
 0x218   : > { %1800 = vmatprep.mubr.f32.mxu1 %v2357_v48  ;;  %1838 = vmatprep.mubr.f32.mxu0 %v2357_v48 }
 0x219   : > { %1845 = vmatprep.subr.mxu1 %v978_v50  ;;  %1883 = vmatprep.subr.mxu0 %v2363_v51 }
 0x21a   : > { %1801 = vmatmul.mubr.f32.gmra.mxu1 %v2360_v49  ;;  %1839 = vmatmul.mubr.f32.gmra.mxu0 %v2360_v49 }
 0x21b   : > { %1846 = vmatpush3.msra.mxu1 %v978_v50  ;;  %1884 = vmatpush3.msra.mxu0 %v2363_v51 }
 0x21c   : > { %1847 = vmatprep.subr.mxu1 %v977_v52  ;;  %1873 = vmatprep.mubr.f32.mxu1 %v712_v41 }
 0x21d   : > { %1885 = vmatprep.subr.mxu0 %v2375_v53  ;;  %1911 = vmatprep.mubr.f32.mxu0 %v712_v41 }
 0x21e   : > { %1848 = vmatpush3.msra.mxu1 %v977_v52  ;;  %1886 = vmatpush3.msra.mxu0 %v2375_v53 }
 0x21f   : > { %1849 = vmatprep.subr.mxu1 %v976_v54  ;;  %1887 = vmatprep.subr.mxu0 %v2378_v55 }
 0x220   : > { %1850 = vmatpush3.msra.mxu1 %v976_v54  ;;  %1888 = vmatpush3.msra.mxu0 %v2378_v55 }
 0x221   : > { %1851 = vmatprep.subr.mxu1 %v975_v56  ;;  %1889 = vmatprep.subr.mxu0 %v2382_v57 }
 0x222   : > { %1852 = vmatpush3.msra.mxu1 %v975_v56  ;;  %1890 = vmatpush3.msra.mxu0 %v2382_v57 }
 0x223   : > { %1853 = vmatprep.subr.mxu1 %v974_v58  ;;  %1891 = vmatprep.subr.mxu0 %v2386_v59 }
 0x224   : > { %1854 = vmatpush3.msra.mxu1 %v974_v58  ;;  %1892 = vmatpush3.msra.mxu0 %v2386_v59 }
 0x225   : > { %1855 = vmatprep.subr.mxu1 %v973_v60  ;;  %1893 = vmatprep.subr.mxu0 %v2390_v61 }
 0x226   : > { %1856 = vmatpush3.msra.mxu1 %v973_v60  ;;  %1894 = vmatpush3.msra.mxu0 %v2390_v61 }
 0x227   : > { %1857 = vmatprep.subr.mxu1 %v972_v62  ;;  %1895 = vmatprep.subr.mxu0 %v2394_v63 }
 0x228   : > { %1858 = vmatpush3.msra.mxu1 %v972_v62  ;;  %1896 = vmatpush3.msra.mxu0 %v2394_v63 }
 0x229   : > { %1859 = vmatprep.subr.mxu1 %v971_v0  ;;  %1897 = vmatprep.subr.mxu0 %v2398_v1 }
 0x22a   : > { %1860 = vmatpush3.msra.mxu1 %v971_v0  ;;  %1898 = vmatpush3.msra.mxu0 %v2398_v1 }
 0x22b   : > { %1861 = vmatprep.subr.mxu1 %v970_v2  ;;  %1899 = vmatprep.subr.mxu0 %v2402_v3 }
 0x22c   : > { %1862 = vmatpush3.msra.mxu1 %v970_v2  ;;  %1900 = vmatpush3.msra.mxu0 %v2402_v3 }
 0x22d   : > { %1863 = vmatprep.subr.mxu1 %v969_v4  ;;  %1901 = vmatprep.subr.mxu0 %v1092_v5 }
 0x22e   : > { %1864 = vmatpush3.msra.mxu1 %v969_v4  ;;  %1902 = vmatpush3.msra.mxu0 %v1092_v5 }
 0x22f   : > { %1865 = vmatprep.subr.mxu1 %v968_v6  ;;  %1903 = vmatprep.subr.mxu0 %v1091_v7 }
 0x230   : > { %1866 = vmatpush3.msra.mxu1 %v968_v6  ;;  %1904 = vmatpush3.msra.mxu0 %v1091_v7 }
 0x231   : > { %1867 = vmatprep.subr.mxu1 %v967_v8  ;;  %1905 = vmatprep.subr.mxu0 %v1090_v9 }
 0x232   : > { %1868 = vmatpush3.msra.mxu1 %v967_v8  ;;  %1906 = vmatpush3.msra.mxu0 %v1090_v9 }
 0x233   : > { %1869 = vmatprep.subr.mxu1 %v966_v10  ;;  %1907 = vmatprep.subr.mxu0 %v1089_v11 }
 0x234   : > { %1870 = vmatpush3.msra.mxu1 %v966_v10  ;;  %1908 = vmatpush3.msra.mxu0 %v1089_v11 }
 0x235   : > { %1871 = vmatprep.subr.mxu1 %v965_v12  ;;  %1909 = vmatprep.subr.mxu0 %v1088_v13 }
 0x236   : > { %1872 = vmatpush3.msra.mxu1 %v965_v12  ;;  %1910 = vmatpush3.msra.mxu0 %v1088_v13 }
 0x237   : > { %1874 = vmatmul.mubr.f32.vlgmr.msra.gmra.mxu1 %v2348_v43  ;;  %1917 = vmatprep.subr.mxu1 %v2342_v18 }
 0x238   : > { %1912 = vmatmul.mubr.f32.vlgmr.msra.gmra.mxu0 %v2348_v43  ;;  %1876 = vmatprep.mubr.f32.mxu1 %v2357_v48 }
 0x239   : > { %1933 = vmatpush3.msra.mxu1 %v2342_v18 }
 0x23a   : > { %1918 = vmatprep.subr.mxu1 %v2351_v47 }
 0x23b   : > { %1934 = vmatpush3.msra.mxu1 %v2351_v47 }
 0x23c   : > { %1877 = vmatmul.mubr.f32.gmra.mxu1 %v2360_v49  ;;  %1919 = vmatprep.subr.mxu1 %v2363_v51 }
 0x23d   : > { %1935 = vmatpush3.msra.mxu1 %v2363_v51  ;;  %1914 = vmatprep.mubr.f32.mxu1 %v2357_v48 }
 0x23e   : > { %1920 = vmatprep.subr.mxu1 %v2375_v53 }
 0x23f   : > { %1936 = vmatpush3.msra.mxu1 %v2375_v53 }
 0x240   : > { %1921 = vmatprep.subr.mxu1 %v2378_v55 }
 0x241   : > { %1937 = vmatpush3.msra.mxu1 %v2378_v55 }
 0x242   : > { %1922 = vmatprep.subr.mxu1 %v2382_v57 }
 0x243   : > { %1938 = vmatpush3.msra.mxu1 %v2382_v57 }
 0x244   : > { %1923 = vmatprep.subr.mxu1 %v2386_v59 }
 0x245   : > { %1939 = vmatpush3.msra.mxu1 %v2386_v59 }
 0x246   : > { %1924 = vmatprep.subr.mxu1 %v2390_v61 }
 0x247   : > { %1940 = vmatpush3.msra.mxu1 %v2390_v61 }
 0x248   : > { %1925 = vmatprep.subr.mxu1 %v2394_v63 }
 0x249   : > { %1941 = vmatpush3.msra.mxu1 %v2394_v63 }
 0x24a   : > { %1926 = vmatprep.subr.mxu1 %v2398_v1 }
 0x24b   : > { %1942 = vmatpush3.msra.mxu1 %v2398_v1 }
 0x24c   : > { %1927 = vmatprep.subr.mxu1 %v2402_v3 }
 0x24d   : > { %1943 = vmatpush3.msra.mxu1 %v2402_v3 }
 0x24e   : > { %1928 = vmatprep.subr.mxu1 %v1092_v5 }
 0x24f   : > { %1944 = vmatpush3.msra.mxu1 %v1092_v5 }
 0x250   : > { %1929 = vmatprep.subr.mxu1 %v1091_v7 }
 0x251   : > { %1945 = vmatpush3.msra.mxu1 %v1091_v7 }
 0x252   : > { %1930 = vmatprep.subr.mxu1 %v1090_v9 }
 0x253   : > { %1946 = vmatpush3.msra.mxu1 %v1090_v9 }
 0x254   : > { %1931 = vmatprep.subr.mxu1 %v1089_v11 }
 0x255   : > { %1947 = vmatpush3.msra.mxu1 %v1089_v11 }
 0x256   : > { %1932 = vmatprep.subr.mxu1 %v1088_v13 }
 0x257   : > { %1948 = vmatpush3.msra.mxu1 %v1088_v13 }
 0x258   : > { %1915 = vmatmul.mubr.f32.vlgmr.msra.gmra.mxu1 %v2360_v49 }
 0x2d4   : > { %v1799_v14 = vpop.f32.mrf.mxu1  ;;  %v1837_v15 = vpop.f32.mrf.mxu0 }
 0x2d6   : > { %v802_v16 = vpop.f32.mrf.mxu1  ;;  %v924_v17 = vpop.f32.mrf.mxu0 }
 0x2d7   : > { %v1553_v18 = vpack.c.bf16 %v1799_v14, %v802_v16  ;;  %v1563_v19 = vpack.c.bf16 %v1837_v15, %v924_v17 }
 0x2d9   : > { %1554 = vst [vmem:[%s2274_s12] sm:$0xff] %v1553_v18   ;;  %1591 = vst [vmem:[%s2274_s12 + $0x10] sm:$0xff] %v1563_v19  }
 0x2da   : > { %v1802_v20 = vpop.f32.mrf.mxu1  ;;  %v1840_v21 = vpop.f32.mrf.mxu0 }
 0x2dc   : > { %v812_v22 = vpop.f32.mrf.mxu1  ;;  %v934_v23 = vpop.f32.mrf.mxu0 }
 0x2dd   : > { %v1558_v24 = vpack.c.bf16 %v1802_v20, %v812_v22  ;;  %v1568_v25 = vpack.c.bf16 %v1840_v21, %v934_v23 }
 0x2df   : > { %1590 = vst [vmem:[%s2274_s12 + $0x8] sm:$0xff] %v1558_v24   ;;  %1592 = vst [vmem:[%s2274_s12 + $0x18] sm:$0xff] %v1568_v25  }
 0x2f7   : > { %v1875_v26 = vpop.f32.mrf.mxu1 }
 0x2f8   : > { %v1913_v27 = vpop.f32.mrf.mxu0 }
 0x2f9   : > { %v1047_v28 = vpop.f32.mrf.mxu1 }
 0x2fa   : > { %v1573_v29 = vpack.c.bf16 %v1875_v26, %v1047_v28  ;;  %v1170_v30 = vpop.f32.mrf.mxu0 }
 0x2fb   : > { %v1583_v31 = vpack.c.bf16 %v1913_v27, %v1170_v30 }
 0x2fc   : > { %1593 = vst [vmem:[%s2274_s12 + $0x20] sm:$0xff] %v1573_v29   ;;  %v1878_v32 = vpop.f32.mrf.mxu1 }
 0x2fd   : > { %1595 = vst [vmem:[%s2274_s12 + $0x30] sm:$0xff] %v1583_v31  }
 0x2fe   : > { %v1057_v33 = vpop.f32.mrf.mxu1 }
 0x2ff   : > { %v1578_v34 = vpack.c.bf16 %v1878_v32, %v1057_v33 }
 0x301   : > { %1594 = vst [vmem:[%s2274_s12 + $0x28] sm:$0xff] %v1578_v34  }
 0x318   : > { %v1916_v35 = vpop.f32.mrf.mxu1 }
 0x31a   : > { %v1180_v36 = vpop.f32.mrf.mxu1 }
 0x31b   : > { %v1588_v37 = vpack.c.bf16 %v1916_v35, %v1180_v36 }
 0x31d   : > { %1596 = vst [vmem:[%s2274_s12 + $0x38] sm:$0xff] %v1588_v37  }
 0x31e PF: > { %1225 = sbr.rel (!%p2212_p6) target bundleno = 806 (0x326), region = 68  ;;  %s1549_s20 = sshll.u32 (%p2212_p6), %s2102_s30, 4  ;;  %v1245_v38 = vld [vmem:[%s2274_s12] sm:$0xff] (%p2212_p6)   ;;  %v1249_v39 = vld [vmem:[%s2274_s12 + $0x8] sm:$0xff] (%p2212_p6)   ;;  %v1253_v40 = vld [vmem:[%s2274_s12 + $0x10] sm:$0xff] (%p2212_p6)  }
 0x31f   : > { %s1228_s13 = scalar_lea.vmem (%p2212_p6), %s2487_s8, %s1549_s20  ;;  %v1257_v41 = vld [vmem:[%s2274_s12 + $0x18] sm:$0xff] (%p2212_p6)   ;;  %v1261_v42 = vld [vmem:[%s2274_s12 + $0x20] sm:$0xff] (%p2212_p6)   ;;  %v1265_v43 = vld [vmem:[%s2274_s12 + $0x28] sm:$0xff] (%p2212_p6)  }
 0x320   : > { %1246 = vst [vmem:[%s1228_s13] sm:$0xff] (%p2212_p6), %v1245_v38   ;;  %1250 = vst [vmem:[%s1228_s13 + $0x8] sm:$0xff] (%p2212_p6), %v1249_v39   ;;  %v1269_v44 = vld [vmem:[%s2274_s12 + $0x30] sm:$0xff] (%p2212_p6)  }
 0x321   : > { %1254 = vst [vmem:[%s1228_s13 + $0x20] sm:$0xff] (%p2212_p6), %v1253_v40   ;;  %1258 = vst [vmem:[%s1228_s13 + $0x28] sm:$0xff] (%p2212_p6), %v1257_v41  }
 0x322   : > { %1262 = vst [vmem:[%s1228_s13 + $0x40] sm:$0xff] (%p2212_p6), %v1261_v42   ;;  %1266 = vst [vmem:[%s1228_s13 + $0x48] sm:$0xff] (%p2212_p6), %v1265_v43  }
 0x323   : > { %1270 = vst [vmem:[%s1228_s13 + $0x60] sm:$0xff] %v1269_v44  }
 0x324   : > { %v1273_v45 = vld [vmem:[%s2274_s12 + $0x38] sm:$0xff]  }
 0x325   : > { %1274 = vst [vmem:[%s1228_s13 + $0x68] sm:$0xff] %v1273_v45  }
 0x326 PF: > { %s20_s11 = sadd.s32 1, %s2114_s11   ;;  %s2501_s30 = sld [smem:[#allocation11_spill]] }
 0x327   : > { %p17_p6 = scmp.ge.s32.totalorder %s20_s11, 6   ;;  %s2502_s29 = sld [smem:[#allocation7_spill]] }
 0x328   : > { %s2503_s16 = sld [smem:[#allocation8_spill]]  ;;  %s2506_s27 = smov %s2094_s28 }
 0x329   : > { %s2504_s9 = sld [smem:[#allocation9_spill]] }
 0x32a   : > { %s2505_s10 = sld [smem:[#allocation10_spill]]  ;;  %19 = sbr.rel (!%p17_p6) target bundleno = 6 (0x6), region = 159 }
 0x32c   : > { %s2507_s28 = smov %s2501_s30 }
 0x32e   : > { %s2508_s30 = smov %s2503_s16 }
 0x32f   :  { %1350 = vsyncpa [#allocation4], 1 }
 0x330   :  { %1352 = vsyncpa [#allocation4 + $0x1], 1 }

</bundles_post_ra>
